<compile_context>
chip_gen: v7x
topology: tpu7x:2x2x1
jax: 0.10.0
libtpu: 0.0.40
codegen_flags: <defaults>
</compile_context>

<pallas_src>
import functools

import jax
import jax.numpy as jnp
from jax import lax
from jax.experimental import pallas as pl
from jax.experimental.pallas import tpu as pltpu


def _rbm_kernel(v_ref, wt_ref, w_ref, bh_ref, bv_ref, uh_ref, uv_ref, vk_ref, *, k):
    # v_ref  : (TB, V) f32, values in {0, 1}
    # wt_ref : (V, H)  bf16  (== w.T, pre-transposed in the wrapper)
    # w_ref  : (H, V)  bf16
    # bh_ref : (1, H)  f32 ; bv_ref : (1, V) f32
    # uh_ref : (k, TB, H) f32 uniforms in [0, 1)  -- per-tile slice
    # uv_ref : (k, TB, V) f32 uniforms in [0, 1)
    wt = wt_ref[...]
    w = w_ref[...]
    bh = bh_ref[...]
    bv = bv_ref[...]

    def gibbs(step, vs):
        # ---- sample h | v :  sigmoid(v @ w.T + bh) ----
        h_lin = jnp.dot(vs.astype(jnp.bfloat16), wt,
                        preferred_element_type=jnp.float32) + bh      # (TB, H) f32
        prob_h = jax.nn.sigmoid(h_lin)
        samp_h = (uh_ref[step] < prob_h).astype(jnp.bfloat16)         # {0,1} bf16

        # ---- sample v | h :  sigmoid(h @ w + bv) ----
        v_lin = jnp.dot(samp_h, w,
                        preferred_element_type=jnp.float32) + bv       # (TB, V) f32
        prob_v = jax.nn.sigmoid(v_lin)
        return (uv_ref[step] < prob_v).astype(jnp.float32)

    vs = v_ref[...]
    if k <= 2:
        for step in range(k):          # small static CD-k: full unroll is fine
            vs = gibbs(step, vs)
    else:
        vs = lax.fori_loop(0, k, gibbs, vs, unroll=2)
    vk_ref[...] = vs                   # single store per tile


def rbm_forward(v, w, bh, bv, noise_key, *, cd_k=1, tb=256):
    """Pallas RBM forward.  Returns (v, v_k) like the torch module."""
    B, V = v.shape
    H, Vw = w.shape
    assert Vw == V

    tb = max(8, int(tb))
    b_pad = pl.cdiv(B, tb) * tb

    v32 = v.astype(jnp.float32)
    if b_pad != B:
        v_pad = jnp.pad(v32, ((0, b_pad - B), (0, 0)))
    else:
        v_pad = v32

    # bf16 weights: halves HBM->VMEM DMA and hits the native MXU path.
    w_bf = w.astype(jnp.bfloat16)                      # (H, V)
    wt_bf = w_bf.T                                     # (V, H), transpose hoisted out of the kernel
    bh2 = bh.reshape(1, H).astype(jnp.float32)
    bv2 = bv.reshape(1, V).astype(jnp.float32)

    kh, kv = jax.random.split(noise_key)
    u_h = jax.random.uniform(kh, (cd_k, b_pad, H), dtype=jnp.float32)
    u_v = jax.random.uniform(kv, (cd_k, b_pad, V), dtype=jnp.float32)

    kernel = functools.partial(_rbm_kernel, k=cd_k)

    vk = pl.pallas_call(
        kernel,
        out_shape=jax.ShapeDtypeStruct((b_pad, V), jnp.float32),
        grid=(b_pad // tb,),
        in_specs=[
            pl.BlockSpec((tb, V), lambda i: (i, 0)),            # v tile
            pl.BlockSpec((V, H), lambda i: (0, 0)),             # w.T, VMEM-resident
            pl.BlockSpec((H, V), lambda i: (0, 0)),             # w,   VMEM-resident
            pl.BlockSpec((1, H), lambda i: (0, 0)),             # bh
            pl.BlockSpec((1, V), lambda i: (0, 0)),             # bv
            pl.BlockSpec((cd_k, tb, H), lambda i: (0, i, 0)),   # hidden-unit noise
            pl.BlockSpec((cd_k, tb, V), lambda i: (0, i, 0)),   # visible-unit noise
        ],
        out_specs=pl.BlockSpec((tb, V), lambda i: (i, 0)),
        compiler_params=pltpu.CompilerParams(
            dimension_semantics=("parallel",),
            vmem_limit_bytes=64 * 1024 * 1024,
        ),
    )(v_pad, wt_bf, w_bf, bh2, bv2, u_h, u_v)

    return v, vk[:B]


if __name__ == "__main__":
    # Small shapes consistent with the module: v in (batch, vsize).
    B, VSIZE, HSIZE, CD_K = 8, 256, 128, 2

    key = jax.random.PRNGKey(0)
    kw, kbv, kbh, kvis, knoise = jax.random.split(key, 5)

    # Deterministic parameter init mirroring torch: randn * 0.01
    w = 0.01 * jax.random.normal(kw, (HSIZE, VSIZE), dtype=jnp.float32)
    bv = 0.01 * jax.random.normal(kbv, (VSIZE,), dtype=jnp.float32)
    bh = 0.01 * jax.random.normal(kbh, (HSIZE,), dtype=jnp.float32)

    # Binary visible input (typical RBM usage).
    v = (jax.random.uniform(kvis, (B, VSIZE)) < 0.5).astype(jnp.float32)

    v0_out, vk_out = rbm_forward(v, w, bh, bv, knoise, cd_k=CD_K, tb=128)
    jax.block_until_ready((v0_out, vk_out))

    # Sanity checks: passthrough output matches input, samples are binary.
    assert v0_out.shape == (B, VSIZE) and vk_out.shape == (B, VSIZE)
    assert bool(jnp.all(v0_out == v))
    assert bool(jnp.all((vk_out == 0.0) | (vk_out == 1.0)))

    print("KERNEL_OK")
</pallas_src>

<mosaic_0001>
module attributes {stable_mosaic.version = 11 : i64} {
  func.func @_rbm_kernel(%arg0: i32, %arg1: memref<128x256xf32, #tpu.memory_space<vmem>>, %arg2: memref<256x128xbf16, #tpu.memory_space<vmem>>, %arg3: memref<128x256xbf16, #tpu.memory_space<vmem>>, %arg4: memref<1x128xf32, #tpu.memory_space<vmem>>, %arg5: memref<1x256xf32, #tpu.memory_space<vmem>>, %arg6: memref<2x128x128xf32, #tpu.memory_space<vmem>>, %arg7: memref<2x128x256xf32, #tpu.memory_space<vmem>>, %arg8: memref<128x256xf32, #tpu.memory_space<vmem>>) attributes {dimension_semantics = [#tpu.dimension_semantics<parallel>], iteration_bounds = array<i64: 1>, scalar_prefetch = 0 : i64, scratch_operands = 0 : i64, tpu.core_type = #tpu.core_type<tc>, window_params = [{transform_indices = @transform_0, window_bounds = array<i64: 128, 256>}, {pipeline_mode = #tpu.pipeline_mode<synchronous>, transform_indices = @transform_1, window_bounds = array<i64: 256, 128>}, {pipeline_mode = #tpu.pipeline_mode<synchronous>, transform_indices = @transform_2, window_bounds = array<i64: 128, 256>}, {pipeline_mode = #tpu.pipeline_mode<synchronous>, transform_indices = @transform_3, window_bounds = array<i64: 1, 128>}, {pipeline_mode = #tpu.pipeline_mode<synchronous>, transform_indices = @transform_4, window_bounds = array<i64: 1, 256>}, {transform_indices = @transform_5, window_bounds = array<i64: 2, 128, 128>}, {transform_indices = @transform_6, window_bounds = array<i64: 2, 128, 256>}, {transform_indices = @transform_7, window_bounds = array<i64: 128, 256>}]} {
    %c0 = arith.constant 0 : index
    %c0_0 = arith.constant 0 : index
    %0 = vector.load %arg2[%c0, %c0_0] : memref<256x128xbf16, #tpu.memory_space<vmem>>, vector<256x128xbf16>
    %c0_1 = arith.constant 0 : index
    %c0_2 = arith.constant 0 : index
    %1 = vector.load %arg3[%c0_1, %c0_2] : memref<128x256xbf16, #tpu.memory_space<vmem>>, vector<128x256xbf16>
    %c0_3 = arith.constant 0 : index
    %c0_4 = arith.constant 0 : index
    %2 = vector.load %arg4[%c0_3, %c0_4] : memref<1x128xf32, #tpu.memory_space<vmem>>, vector<1x128xf32>
    %c0_5 = arith.constant 0 : index
    %c0_6 = arith.constant 0 : index
    %3 = vector.load %arg5[%c0_5, %c0_6] : memref<1x256xf32, #tpu.memory_space<vmem>>, vector<1x256xf32>
    %c0_7 = arith.constant 0 : index
    %c0_8 = arith.constant 0 : index
    %4 = vector.load %arg1[%c0_7, %c0_8] : memref<128x256xf32, #tpu.memory_space<vmem>>, vector<128x256xf32>
    %5 = arith.truncf %4 : vector<128x256xf32> to vector<128x256xbf16>
    %cst = arith.constant dense<0.000000e+00> : vector<128x128xf32>
    %6 = tpu.matmul %5, %0, %cst {dimension_numbers = #tpu.dot_dimension_numbers<[1], [0], [0], [1], [0, 0, 1, 1], [], []>} : vector<128x256xbf16>, vector<256x128xbf16>, vector<128x128xf32> -> vector<128x128xf32>
    %7 = vector.broadcast %2 : vector<1x128xf32> to vector<128x128xf32>
    %8 = arith.addf %6, %7 : vector<128x128xf32>
    %9 = arith.negf %8 : vector<128x128xf32>
    %10 = math.exp %9 : vector<128x128xf32>
    %cst_9 = arith.constant 1.000000e+00 : f32
    %11 = vector.broadcast %cst_9 : f32 to vector<128x128xf32>
    %12 = arith.addf %11, %10 : vector<128x128xf32>
    %13 = arith.divf %11, %12 : vector<128x128xf32>
    %c0_10 = arith.constant 0 : index
    %c0_11 = arith.constant 0 : index
    %c0_12 = arith.constant 0 : index
    %14 = vector.load %arg6[%c0_10, %c0_11, %c0_12] : memref<2x128x128xf32, #tpu.memory_space<vmem>>, vector<1x128x128xf32>
    %15 = vector.shape_cast %14 : vector<1x128x128xf32> to vector<128x128xf32>
    %16 = arith.cmpf olt, %15, %13 : vector<128x128xf32>
    %17 = arith.extui %16 : vector<128x128xi1> to vector<128x128xi32>
    %18 = arith.sitofp %17 : vector<128x128xi32> to vector<128x128xf32>
    %19 = arith.truncf %18 : vector<128x128xf32> to vector<128x128xbf16>
    %cst_13 = arith.constant dense<0.000000e+00> : vector<128x256xf32>
    %20 = tpu.matmul %19, %1, %cst_13 {dimension_numbers = #tpu.dot_dimension_numbers<[1], [0], [0], [1], [0, 0, 1, 1], [], []>} : vector<128x128xbf16>, vector<128x256xbf16>, vector<128x256xf32> -> vector<128x256xf32>
    %21 = vector.broadcast %3 : vector<1x256xf32> to vector<128x256xf32>
    %22 = arith.addf %20, %21 : vector<128x256xf32>
    %23 = arith.negf %22 : vector<128x256xf32>
    %24 = math.exp %23 : vector<128x256xf32>
    %cst_14 = arith.constant 1.000000e+00 : f32
    %25 = vector.broadcast %cst_14 : f32 to vector<128x256xf32>
    %26 = arith.addf %25, %24 : vector<128x256xf32>
    %27 = arith.divf %25, %26 : vector<128x256xf32>
    %c0_15 = arith.constant 0 : index
    %c0_16 = arith.constant 0 : index
    %c0_17 = arith.constant 0 : index
    %28 = vector.load %arg7[%c0_15, %c0_16, %c0_17] : memref<2x128x256xf32, #tpu.memory_space<vmem>>, vector<1x128x256xf32>
    %29 = vector.shape_cast %28 : vector<1x128x256xf32> to vector<128x256xf32>
    %30 = arith.cmpf olt, %29, %27 : vector<128x256xf32>
    %31 = arith.extui %30 : vector<128x256xi1> to vector<128x256xi32>
    %32 = arith.sitofp %31 : vector<128x256xi32> to vector<128x256xf32>
    %33 = arith.truncf %32 : vector<128x256xf32> to vector<128x256xbf16>
    %cst_18 = arith.constant dense<0.000000e+00> : vector<128x128xf32>
    %34 = tpu.matmul %33, %0, %cst_18 {dimension_numbers = #tpu.dot_dimension_numbers<[1], [0], [0], [1], [0, 0, 1, 1], [], []>} : vector<128x256xbf16>, vector<256x128xbf16>, vector<128x128xf32> -> vector<128x128xf32>
    %35 = vector.broadcast %2 : vector<1x128xf32> to vector<128x128xf32>
    %36 = arith.addf %34, %35 : vector<128x128xf32>
    %37 = arith.negf %36 : vector<128x128xf32>
    %38 = math.exp %37 : vector<128x128xf32>
    %cst_19 = arith.constant 1.000000e+00 : f32
    %39 = vector.broadcast %cst_19 : f32 to vector<128x128xf32>
    %40 = arith.addf %39, %38 : vector<128x128xf32>
    %41 = arith.divf %39, %40 : vector<128x128xf32>
    %c1 = arith.constant 1 : index
    %c0_20 = arith.constant 0 : index
    %c0_21 = arith.constant 0 : index
    %42 = vector.load %arg6[%c1, %c0_20, %c0_21] : memref<2x128x128xf32, #tpu.memory_space<vmem>>, vector<1x128x128xf32>
    %43 = vector.shape_cast %42 : vector<1x128x128xf32> to vector<128x128xf32>
    %44 = arith.cmpf olt, %43, %41 : vector<128x128xf32>
    %45 = arith.extui %44 : vector<128x128xi1> to vector<128x128xi32>
    %46 = arith.sitofp %45 : vector<128x128xi32> to vector<128x128xf32>
    %47 = arith.truncf %46 : vector<128x128xf32> to vector<128x128xbf16>
    %cst_22 = arith.constant dense<0.000000e+00> : vector<128x256xf32>
    %48 = tpu.matmul %47, %1, %cst_22 {dimension_numbers = #tpu.dot_dimension_numbers<[1], [0], [0], [1], [0, 0, 1, 1], [], []>} : vector<128x128xbf16>, vector<128x256xbf16>, vector<128x256xf32> -> vector<128x256xf32>
    %49 = vector.broadcast %3 : vector<1x256xf32> to vector<128x256xf32>
    %50 = arith.addf %48, %49 : vector<128x256xf32>
    %51 = arith.negf %50 : vector<128x256xf32>
    %52 = math.exp %51 : vector<128x256xf32>
    %cst_23 = arith.constant 1.000000e+00 : f32
    %53 = vector.broadcast %cst_23 : f32 to vector<128x256xf32>
    %54 = arith.addf %53, %52 : vector<128x256xf32>
    %55 = arith.divf %53, %54 : vector<128x256xf32>
    %c1_24 = arith.constant 1 : index
    %c0_25 = arith.constant 0 : index
    %c0_26 = arith.constant 0 : index
    %56 = vector.load %arg7[%c1_24, %c0_25, %c0_26] : memref<2x128x256xf32, #tpu.memory_space<vmem>>, vector<1x128x256xf32>
    %57 = vector.shape_cast %56 : vector<1x128x256xf32> to vector<128x256xf32>
    %58 = arith.cmpf olt, %57, %55 : vector<128x256xf32>
    %59 = arith.extui %58 : vector<128x256xi1> to vector<128x256xi32>
    %60 = arith.sitofp %59 : vector<128x256xi32> to vector<128x256xf32>
    %c0_27 = arith.constant 0 : index
    %c0_28 = arith.constant 0 : index
    %61 = vector.load %arg8[%c0_27, %c0_28] : memref<128x256xf32, #tpu.memory_space<vmem>>, vector<128x256xf32>
    tpu.vector_store %arg8[%c0_27, %c0_28], %60 {strides = array<i32>} : memref<128x256xf32, #tpu.memory_space<vmem>>, vector<128x256xf32>,
    return
  }
  func.func @transform_0(%arg0: i32) -> (i32, i32) {
    %c0_i32 = arith.constant 0 : i32
    %c0_i32_0 = arith.constant 0 : i32
    return %arg0, %c0_i32 : i32, i32
  }
  func.func @transform_1(%arg0: i32) -> (i32, i32) {
    %c0_i32 = arith.constant 0 : i32
    %c0_i32_0 = arith.constant 0 : i32
    %c0_i32_1 = arith.constant 0 : i32
    return %c0_i32, %c0_i32_0 : i32, i32
  }
  func.func @transform_2(%arg0: i32) -> (i32, i32) {
    %c0_i32 = arith.constant 0 : i32
    %c0_i32_0 = arith.constant 0 : i32
    %c0_i32_1 = arith.constant 0 : i32
    return %c0_i32, %c0_i32_0 : i32, i32
  }
  func.func @transform_3(%arg0: i32) -> (i32, i32) {
    %c0_i32 = arith.constant 0 : i32
    %c0_i32_0 = arith.constant 0 : i32
    %c0_i32_1 = arith.constant 0 : i32
    return %c0_i32, %c0_i32_0 : i32, i32
  }
  func.func @transform_4(%arg0: i32) -> (i32, i32) {
    %c0_i32 = arith.constant 0 : i32
    %c0_i32_0 = arith.constant 0 : i32
    %c0_i32_1 = arith.constant 0 : i32
    return %c0_i32, %c0_i32_0 : i32, i32
  }
  func.func @transform_5(%arg0: i32) -> (i32, i32, i32) {
    %c0_i32 = arith.constant 0 : i32
    %c0_i32_0 = arith.constant 0 : i32
    %c0_i32_1 = arith.constant 0 : i32
    return %c0_i32, %arg0, %c0_i32_0 : i32, i32, i32
  }
  func.func @transform_6(%arg0: i32) -> (i32, i32, i32) {
    %c0_i32 = arith.constant 0 : i32
    %c0_i32_0 = arith.constant 0 : i32
    %c0_i32_1 = arith.constant 0 : i32
    return %c0_i32, %arg0, %c0_i32_0 : i32, i32, i32
  }
  func.func @transform_7(%arg0: i32) -> (i32, i32) {
    %c0_i32 = arith.constant 0 : i32
    %c0_i32_0 = arith.constant 0 : i32
    return %arg0, %c0_i32 : i32, i32
  }
}

</mosaic_0001>

<bundles_post_ra>
// kernel: tpu_custom_call.1
= control target key start
LH: loop header
LB: loop body
LE: loop exit
PB: predicated region body
PF: predicated region fallthrough
CT: control target
= control target key end

     0   :  { %12 = vsyncpa [#allocation3], 0  ;;  %s3364_s0 = inlined_call_operand.hbm [shape: f32[128,256], index: 0, kind: input, shape index: {}]   ;;  %s3365_s1 = inlined_call_operand.hbm [shape: bf16[256,128], index: 1, kind: input, shape index: {}]   ;;  %s3366_s2 = inlined_call_operand.hbm [shape: bf16[128,256], index: 2, kind: input, shape index: {}]   ;;  %s3367_s3 = inlined_call_operand.hbm [shape: f32[1,128], index: 3, kind: input, shape index: {}]   ;;  %s3368_s4 = inlined_call_operand.hbm [shape: f32[1,256], index: 4, kind: input, shape index: {}]   ;;  %s3369_s5 = inlined_call_operand.hbm [shape: f32[2,128,128], index: 5, kind: input, shape index: {}]   ;;  %s3370_s6 = inlined_call_operand.hbm [shape: f32[2,128,256], index: 6, kind: input, shape index: {}]   ;;  %s3371_s7 = inlined_call_operand.hbm [shape: f32[128,256], index: 7, kind: output, shape index: {}]  }
   0x1   :  { %13 = vsyncpa [#allocation6], 0 }
   0x2   :  { %14 = vsyncpa [#allocation9], 0 }
   0x3   :  { %15 = vsyncpa [#allocation12], 0 }
   0x4   :  { %16 = vsyncpa [#allocation4], 0  ;;  %s2921_s24 = smov [#allocation5]   ;;  %s2735_s28 = scalar_lea.hbm %s3365_s1, 2048 }
   0x5   :  { %s34_s25 = sshll.u32 %s2921_s24, 4  ;;  %p2736_p0 = scmp.ne.s32.totalorder %s3365_s1, %s2735_s28  ;;  %s35_s25 = int_to_ptr.vmem [resolvable:$true] %s34_s25 }
   0x6   :  { %p2739_p1 = scmp.lt.u32.totalorder %s2735_s28, %s3365_s1 }
   0x8   :  { %p2741_p2 = pnand %p2739_p1, %p2736_p0 }
   0xa   :  { %2744 = shalt.err (!%p2741_p2)
}
   0xb   :  { %s2745_s10 = scalar_lea.vmem %s35_s25, 2048  ;;  %p2750_p4 = scmp.lt.s32.totalorder %s35_s25, %s35_s25 }
   0xc   :  { %p2746_p3 = scmp.ne.s32.totalorder %s35_s25, %s2745_s10  ;;  %p2751_p5 = scmp.lt.s32.totalorder %s2745_s10, %s2745_s10 }
   0xe   :  { %p2752_p6 = por %p2751_p5, %p2750_p4 }
  0x10   :  { %p2753_p7 = pnand %p2752_p6, %p2746_p3 }
  0x12   :  { %2756 = shalt.err (!%p2753_p7)
}
  0x13   :  { %s2922_s11 = smov 64   ;;  %s2923_s12 = smov 4  }
  0x14   :  { %40 = dma.hbm_to_vmem [thread:$0]  %s3365_s1, 2048, %s35_s25, [#allocation6], %s2922_s11, %s2922_s11, %s2923_s12  }
  0x15   :  { %s2924_s15 = smov [#allocation8]   ;;  %s2757_s19 = scalar_lea.hbm %s3367_s3, 16 }
  0x16   :  { %s59_s16 = sshll.u32 %s2924_s15, 4  ;;  %p2758_p8 = scmp.ne.s32.totalorder %s3367_s3, %s2757_s19  ;;  %s60_s16 = int_to_ptr.vmem [resolvable:$true] %s59_s16 }
  0x17   :  { %p2761_p9 = scmp.lt.u32.totalorder %s2757_s19, %s3367_s3 }
  0x19   :  { %p2763_p10 = pnand %p2761_p9, %p2758_p8 }
  0x1b   :  { %2766 = shalt.err (!%p2763_p10)
}
  0x1c   :  { %s2767_s24 = scalar_lea.vmem %s60_s16, 16  ;;  %s2771_s1 = scalar_lea.vmem %s60_s16, 32 }
  0x1d   :  { %p2768_p11 = scmp.ne.s32.totalorder %s60_s16, %s2767_s24  ;;  %p2772_p12 = scmp.lt.s32.totalorder %s60_s16, %s60_s16 }
  0x1e   :  { %p2773_p13 = scmp.lt.s32.totalorder %s2771_s1, %s2767_s24 }
  0x20   :  { %p2774_p0 = por %p2773_p13, %p2772_p12 }
  0x22   :  { %p2775_p1 = pnand %p2774_p0, %p2768_p11 }
  0x24   :  { %2778 = shalt.err (!%p2775_p1)
}
  0x25   :  { %62 = dma.hbm_to_vmem [thread:$0]  %s3367_s3, 16, %s60_s16, [#allocation9]  }
  0x26   :  { %s2925_s27 = smov [#allocation11]   ;;  %s2926_s29 = smov [#allocation2]  }
  0x27   :  { %s78_s28 = sshll.u32 %s2925_s27, 4  ;;  %s22_s30 = sshll.u32 %s2926_s29, 4  ;;  %s79_s28 = int_to_ptr.vmem [resolvable:$true] %s78_s28  ;;  %s3002_s30 = int_to_ptr.vmem [resolvable:$true] %s22_s30 }
  0x28   :  { %s2779_s10 = scalar_lea.hbm %s3369_s5, 4096 }
  0x29   :  { %p2780_p2 = scmp.ne.s32.totalorder %s3369_s5, %s2779_s10  ;;  %p2783_p3 = scmp.lt.u32.totalorder %s2779_s10, %s3369_s5 }
  0x2b   :  { %p2785_p4 = pnand %p2783_p3, %p2780_p2 }
  0x2d   :  { %2788 = shalt.err (!%p2785_p4)
}
  0x2e   :  { %s2789_s3 = scalar_lea.vmem %s79_s28, 4096  ;;  %p2794_p6 = scmp.lt.s32.totalorder %s79_s28, %s79_s28 }
  0x2f   :  { %p2790_p5 = scmp.ne.s32.totalorder %s79_s28, %s2789_s3  ;;  %p2795_p7 = scmp.lt.s32.totalorder %s2789_s3, %s2789_s3 }
  0x31   :  { %p2796_p8 = por %p2795_p7, %p2794_p6 }
  0x33   :  { %p2797_p9 = pnand %p2796_p8, %p2790_p5 }
  0x35   :  { %2800 = shalt.err (!%p2797_p9)
}
  0x36   :  { %s2927_s15 = smov 128   ;;  %s2928_s16 = smov 8  }
  0x37   :  { %84 = dma.hbm_to_vmem [thread:$0]  %s3369_s5, 4096, %s79_s28, [#allocation12], %s2927_s15, %s2927_s15, %s2928_s16  }
  0x38   :  { %s2801_s21 = scalar_lea.hbm %s3364_s0, 4096 }
  0x39   :  { %p2802_p10 = scmp.ne.s32.totalorder %s3364_s0, %s2801_s21  ;;  %p2805_p11 = scmp.lt.u32.totalorder %s2801_s21, %s3364_s0 }
  0x3b   :  { %p2807_p12 = pnand %p2805_p11, %p2802_p10 }
  0x3d   :  { %2810 = shalt.err (!%p2807_p12)
}
  0x3e   :  { %s2811_s25 = scalar_lea.vmem %s3002_s30, 4096  ;;  %p2816_p0 = scmp.lt.s32.totalorder %s3002_s30, %s3002_s30 }
  0x3f   :  { %p2812_p13 = scmp.ne.s32.totalorder %s3002_s30, %s2811_s25  ;;  %p2817_p1 = scmp.lt.s32.totalorder %s2811_s25, %s2811_s25 }
  0x41   :  { %p2818_p2 = por %p2817_p1, %p2816_p0 }
  0x43   :  { %p2819_p3 = pnand %p2818_p2, %p2812_p13 }
  0x45   :  { %2822 = shalt.err (!%p2819_p3)
}
  0x46   :  { %s2929_s5 = smov 256   ;;  %s2930_s26 = smov 16  }
  0x47   :  { %28 = dma.hbm_to_vmem [thread:$0]  %s3364_s0, 4096, %s3002_s30, [#allocation3], %s2929_s5, %s2929_s5, %s2930_s26  }
  0x48   :  { %s2931_s29 = smov [#allocation7]   ;;  %s2932_s9 = smov [#allocation10]  }
  0x49   :  { %s46_s8 = sshll.u32 %s2931_s29, 4  ;;  %s69_s10 = sshll.u32 %s2932_s9, 4  ;;  %s47_s8 = int_to_ptr.vmem [resolvable:$true] %s46_s8  ;;  %s70_s10 = int_to_ptr.vmem [resolvable:$true] %s69_s10 }
  0x4a   :  { %s2823_s13 = scalar_lea.hbm %s3366_s2, 2048 }
  0x4b   :  { %p2824_p4 = scmp.ne.s32.totalorder %s3366_s2, %s2823_s13  ;;  %p2827_p5 = scmp.lt.u32.totalorder %s2823_s13, %s3366_s2 }
  0x4d   :  { %p2829_p6 = pnand %p2827_p5, %p2824_p4 }
  0x4f   :  { %2832 = shalt.err (!%p2829_p6)
}
  0x50   :  { %s2833_s0 = scalar_lea.vmem %s47_s8, 2048  ;;  %p2838_p8 = scmp.lt.s32.totalorder %s47_s8, %s47_s8 }
  0x51   :  { %p2834_p7 = scmp.ne.s32.totalorder %s47_s8, %s2833_s0  ;;  %p2839_p9 = scmp.lt.s32.totalorder %s2833_s0, %s2833_s0 }
  0x53   :  { %p2840_p10 = por %p2839_p9, %p2838_p8 }
  0x55   :  { %p2841_p11 = pnand %p2840_p10, %p2834_p7 }
  0x57   :  { %2844 = shalt.err (!%p2841_p11)
}
  0x58   :  { %52 = dma.hbm_to_vmem [thread:$0]  %s3366_s2, 2048, %s47_s8, [#allocation6], %s2927_s15, %s2927_s15, %s2928_s16  }
  0x59   :  { %s2845_s22 = scalar_lea.hbm %s3368_s4, 32 }
  0x5a   :  { %p2846_p12 = scmp.ne.s32.totalorder %s3368_s4, %s2845_s22  ;;  %p2849_p13 = scmp.lt.u32.totalorder %s2845_s22, %s3368_s4 }
  0x5c   :  { %p2851_p0 = pnand %p2849_p13, %p2846_p12 }
  0x5e   :  { %2854 = shalt.err (!%p2851_p0)
}
  0x5f   :  { %s2855_s27 = scalar_lea.vmem %s70_s10, 32  ;;  %p2860_p2 = scmp.lt.s32.totalorder %s70_s10, %s70_s10 }
  0x60   :  { %p2856_p1 = scmp.ne.s32.totalorder %s70_s10, %s2855_s27  ;;  %p2861_p3 = scmp.lt.s32.totalorder %s2855_s27, %s2855_s27 }
  0x62   :  { %p2862_p4 = por %p2861_p3, %p2860_p2 }
  0x64   :  { %p2863_p5 = pnand %p2862_p4, %p2856_p1 }
  0x66   :  { %2866 = shalt.err (!%p2863_p5)
}
  0x67   :  { %72 = dma.hbm_to_vmem [thread:$0]  %s3368_s4, 32, %s70_s10, [#allocation9]  }
  0x68   :  { %s2933_s16 = smov [#allocation13]   ;;  %s2867_s9 = scalar_lea.hbm %s3370_s6, 8192 }
  0x69   :  { %s90_s28 = sshll.u32 %s2933_s16, 4  ;;  %p2868_p6 = scmp.ne.s32.totalorder %s3370_s6, %s2867_s9  ;;  %s91_s28 = int_to_ptr.vmem [resolvable:$true] %s90_s28 }
  0x6a   :  { %p2871_p7 = scmp.lt.u32.totalorder %s2867_s9, %s3370_s6 }
  0x6c   :  { %p2873_p8 = pnand %p2871_p7, %p2868_p6 }
  0x6e   :  { %2876 = shalt.err (!%p2873_p8)
}
  0x6f   :  { %s2877_s3 = scalar_lea.vmem %s91_s28, 8192  ;;  %p2882_p10 = scmp.lt.s32.totalorder %s91_s28, %s91_s28 }
  0x70   :  { %p2878_p9 = scmp.ne.s32.totalorder %s91_s28, %s2877_s3  ;;  %p2883_p11 = scmp.lt.s32.totalorder %s2877_s3, %s2877_s3 }
  0x72   :  { %p2884_p12 = por %p2883_p11, %p2882_p10 }
  0x74   :  { %p2885_p13 = pnand %p2884_p12, %p2878_p9 }
  0x76   :  { %2888 = shalt.err (!%p2885_p13)
}
  0x77   :  { %96 = dma.hbm_to_vmem [thread:$0]  %s3370_s6, 8192, %s91_s28, [#allocation12], %s2929_s5, %s2929_s5, %s2930_s26  }
  0x78   :  { %2911 = dma.done.wait [#allocation3], 4096  }
  0x79   :  { %2912 = vsyncadd [#allocation3], 4294963200 }
  0x7a   :  { %2913 = dma.done.wait [#allocation6], 4096  }
  0x7b   :  { %2914 = vsyncadd [#allocation6], 4294963200 }
  0x7c   :  { %2915 = dma.done.wait [#allocation9], 48  }
  0x7d   :  { %2916 = vsyncadd [#allocation9], 4294967248 }
  0x7e   :  { %2917 = dma.done.wait [#allocation12], 12288  }
  0x7f   :  { %2918 = vsyncadd [#allocation12], 4294955008  ;;  %v2310_v0 = vld [vmem:[#allocation5 + $0x40] sm:$0xff]   ;;  %v2312_v2 = vld [vmem:[#allocation5 + $0x48] sm:$0xff]   ;;  %s2937_s6 = smov [#allocation14]  }
  0x80   :  { %v2311_v1 = vld [vmem:[#allocation5] sm:$0xff]   ;;  %2165 = vmatprep.subr.bf16.mxu0 %v2310_v0  ;;  %v2313_v3 = vld [vmem:[#allocation5 + $0x8] sm:$0xff]   ;;  %v2314_v4 = vld [vmem:[#allocation5 + $0x50] sm:$0xff]   ;;  %s1861_s17 = sshll.u32 %s2937_s6, 4  ;;  %s1862_s17 = int_to_ptr.vmem [resolvable:$true] %s1861_s17 }
  0x81   :  { %2166 = vmatpush3.bf16.msra.mxu0 %v2311_v1  ;;  %v2315_v5 = vld [vmem:[#allocation5 + $0x10] sm:$0xff]   ;;  %v2316_v6 = vld [vmem:[#allocation5 + $0x58] sm:$0xff]   ;;  %v2318_v8 = vld [vmem:[#allocation5 + $0x60] sm:$0xff]   ;;  %s2889_s18 = scalar_lea.vmem %s1862_s17, 4096  ;;  %p2894_p1 = scmp.lt.s32.totalorder %s1862_s17, %s1862_s17 }
  0x82   :  { %2167 = vmatprep.subr.bf16.mxu0 %v2312_v2  ;;  %v2317_v7 = vld [vmem:[#allocation5 + $0x18] sm:$0xff]   ;;  %v2319_v9 = vld [vmem:[#allocation5 + $0x20] sm:$0xff]   ;;  %v2320_v10 = vld [vmem:[#allocation5 + $0x68] sm:$0xff]   ;;  %p2890_p0 = scmp.ne.s32.totalorder %s1862_s17, %s2889_s18  ;;  %p2895_p2 = scmp.lt.s32.totalorder %s2889_s18, %s2889_s18 }
  0x83   :  { %v170_v11 = vld [vmem:[#allocation2 + $0x8] sm:$0xff]  ;;  %v172_v12 = vld [vmem:[#allocation2 + $0x18] sm:$0xff]  ;;  %v2322_v15 = vld [vmem:[#allocation5 + $0x70] sm:$0xff]  }
  0x84   :  { %v202_v13 = vpack.c.bf16 %v172_v12, %v170_v11  ;;  %v2321_v14 = vld [vmem:[#allocation5 + $0x28] sm:$0xff]   ;;  %v2323_v16 = vld [vmem:[#allocation5 + $0x30] sm:$0xff]   ;;  %v2324_v17 = vld [vmem:[#allocation5 + $0x78] sm:$0xff]   ;;  %p2896_p3 = por %p2895_p2, %p2894_p1 }
  0x85   :  { %2168 = vmatpush3.bf16.msra.mxu0 %v2313_v3  ;;  %v2325_v18 = vld [vmem:[#allocation5 + $0x38] sm:$0xff]   ;;  %v169_v19 = vld [vmem:[#allocation2] sm:$0xff]  ;;  %v171_v20 = vld [vmem:[#allocation2 + $0x10] sm:$0xff] }
  0x86   :  { %2169 = vmatprep.subr.bf16.mxu0 %v2314_v4  ;;  %351 = vmatprep.mubr.bf16.mxu0 %v202_v13  ;;  %v174_v21 = vld [vmem:[#allocation2 + $0x28] sm:$0xff]  ;;  %v176_v22 = vld [vmem:[#allocation2 + $0x38] sm:$0xff]  ;;  %v201_v23 = vpack.c.bf16 %v171_v20, %v169_v19  ;;  %v173_v25 = vld [vmem:[#allocation2 + $0x20] sm:$0xff]  ;;  %p2897_p4 = pnand %p2896_p3, %p2890_p0 }
  0x87   :  { %v204_v24 = vpack.c.bf16 %v176_v22, %v174_v21  ;;  %v175_v26 = vld [vmem:[#allocation2 + $0x30] sm:$0xff]  ;;  %v178_v27 = vld [vmem:[#allocation2 + $0x48] sm:$0xff]  ;;  %v180_v28 = vld [vmem:[#allocation2 + $0x58] sm:$0xff] }
  0x88   :  { %v203_v29 = vpack.c.bf16 %v175_v26, %v173_v25  ;;  %v206_v30 = vpack.c.bf16 %v180_v28, %v178_v27  ;;  %v177_v31 = vld [vmem:[#allocation2 + $0x40] sm:$0xff]  ;;  %v179_v32 = vld [vmem:[#allocation2 + $0x50] sm:$0xff]  ;;  %v182_v33 = vld [vmem:[#allocation2 + $0x68] sm:$0xff] }
  0x89   :  { %2170 = vmatpush3.bf16.msra.mxu0 %v2315_v5  ;;  %v184_v34 = vld [vmem:[#allocation2 + $0x78] sm:$0xff]  ;;  %v205_v35 = vpack.c.bf16 %v179_v32, %v177_v31  ;;  %v181_v37 = vld [vmem:[#allocation2 + $0x60] sm:$0xff]  ;;  %v183_v38 = vld [vmem:[#allocation2 + $0x70] sm:$0xff] }
  0x8a   :  { %2171 = vmatprep.subr.bf16.mxu0 %v2316_v6  ;;  %v208_v36 = vpack.c.bf16 %v184_v34, %v182_v33  ;;  %v186_v39 = vld [vmem:[#allocation2 + $0x88] sm:$0xff]  ;;  %v188_v40 = vld [vmem:[#allocation2 + $0x98] sm:$0xff]  ;;  %v207_v41 = vpack.c.bf16 %v183_v38, %v181_v37  ;;  %v185_v43 = vld [vmem:[#allocation2 + $0x80] sm:$0xff] }
  0x8b   :  { %v210_v42 = vpack.c.bf16 %v188_v40, %v186_v39  ;;  %v187_v44 = vld [vmem:[#allocation2 + $0x90] sm:$0xff]  ;;  %v190_v45 = vld [vmem:[#allocation2 + $0xa8] sm:$0xff]  ;;  %v192_v46 = vld [vmem:[#allocation2 + $0xb8] sm:$0xff] }
  0x8c   :  { %v209_v47 = vpack.c.bf16 %v187_v44, %v185_v43  ;;  %v212_v48 = vpack.c.bf16 %v192_v46, %v190_v45  ;;  %v189_v49 = vld [vmem:[#allocation2 + $0xa0] sm:$0xff]  ;;  %v191_v50 = vld [vmem:[#allocation2 + $0xb0] sm:$0xff]  ;;  %v194_v51 = vld [vmem:[#allocation2 + $0xc8] sm:$0xff] }
  0x8d   :  { %2172 = vmatpush3.bf16.msra.mxu0 %v2317_v7  ;;  %v196_v52 = vld [vmem:[#allocation2 + $0xd8] sm:$0xff]  ;;  %v211_v53 = vpack.c.bf16 %v191_v50, %v189_v49  ;;  %v193_v55 = vld [vmem:[#allocation2 + $0xc0] sm:$0xff]  ;;  %v195_v56 = vld [vmem:[#allocation2 + $0xd0] sm:$0xff] }
  0x8e   :  { %2173 = vmatprep.subr.bf16.mxu0 %v2318_v8  ;;  %v214_v54 = vpack.c.bf16 %v196_v52, %v194_v51  ;;  %v198_v57 = vld [vmem:[#allocation2 + $0xe8] sm:$0xff]  ;;  %v200_v58 = vld [vmem:[#allocation2 + $0xf8] sm:$0xff]  ;;  %v213_v59 = vpack.c.bf16 %v195_v56, %v193_v55  ;;  %v197_v61 = vld [vmem:[#allocation2 + $0xe0] sm:$0xff] }
  0x8f   :  { %v216_v60 = vpack.c.bf16 %v200_v58, %v198_v57  ;;  %v199_v62 = vld [vmem:[#allocation2 + $0xf0] sm:$0xff]  ;;  %v3114_v12 = vld [vmem:[#allocation7 + $0x64] ss:$8 sps:$4 sm:$0xff]   ;;  %v3116_v13 = vld [vmem:[#allocation7 + $0x60] ss:$8 sps:$4 sm:$0xff]  }
  0x90   :  { %v215_v63 = vpack.c.bf16 %v199_v62, %v197_v61  ;;  %v3110_v11 = vld [vmem:[#allocation7 + $0x50] ss:$8 sps:$4 sm:$0xff]  }
  0x91   :  { %2174 = vmatpush3.bf16.msra.mxu0 %v2319_v9 }
  0x92   :  { %2175 = vmatprep.subr.bf16.mxu0 %v2320_v10 }
  0x95   :  { %2176 = vmatpush3.bf16.msra.mxu0 %v2321_v14 }
  0x96   :  { %2177 = vmatprep.subr.bf16.mxu0 %v2322_v15 }
  0x99   :  { %2178 = vmatpush3.bf16.msra.mxu0 %v2323_v16 }
  0x9a   :  { %2179 = vmatprep.subr.bf16.mxu0 %v2324_v17 }
  0x9d   :  { %2180 = vmatpush3.bf16.msra.mxu0 %v2325_v18 }
  0x9e   :  { %2229 = vmatprep.subr.bf16.mxu0 %v2310_v0  ;;  %v2326_v0 = vld [vmem:[#allocation7 + $0x4] ss:$8 sps:$4 sm:$0xff]  }
  0x9f   :  { %675 = vmatprep.subr.bf16.mxu1 %v2326_v0 }
  0xa0   :  { %352 = vmatmul.mubr.bf16.vlgmr.msra.gmra.mrb[0].mxu0 %v201_v23 }
  0xa1   :  { %359 = vmatprep.mubr.bf16.mxu0 %v204_v24  ;;  %2230 = vmatpush3.bf16.msra.mxu0 %v2311_v1  ;;  %v3081_v1 = vld [vmem:[#allocation7] ss:$8 sps:$4 sm:$0xff]  }
  0xa2   :  { %2231 = vmatprep.subr.bf16.mxu0 %v2312_v2  ;;  %676 = vmatpush1.bf16.msra.mxu1 %v3081_v1  ;;  %v3084_v2 = vld [vmem:[#allocation7 + $0x14] ss:$8 sps:$4 sm:$0xff]  }
  0xa3   :  { %677 = vmatprep.subr.bf16.mxu1 %v3084_v2 }
  0xa5   :  { %2232 = vmatpush3.bf16.msra.mxu0 %v2313_v3  ;;  %v3086_v3 = vld [vmem:[#allocation7 + $0x10] ss:$8 sps:$4 sm:$0xff]  }
  0xa6   :  { %2233 = vmatprep.subr.bf16.mxu0 %v2314_v4  ;;  %678 = vmatpush1.bf16.msra.mxu1 %v3086_v3  ;;  %v3090_v4 = vld [vmem:[#allocation7 + $0x24] ss:$8 sps:$4 sm:$0xff]  }
  0xa7   :  { %679 = vmatprep.subr.bf16.mxu1 %v3090_v4 }
  0xa8   :  { %360 = vmatmul.mubr.bf16.gmra.mrb[4].mxu0 %v203_v29 }
  0xa9   :  { %367 = vmatprep.mubr.bf16.mxu0 %v206_v30  ;;  %2234 = vmatpush3.bf16.msra.mxu0 %v2315_v5  ;;  %v3092_v5 = vld [vmem:[#allocation7 + $0x20] ss:$8 sps:$4 sm:$0xff]  }
  0xaa   :  { %2235 = vmatprep.subr.bf16.mxu0 %v2316_v6  ;;  %680 = vmatpush1.bf16.msra.mxu1 %v3092_v5  ;;  %v3096_v6 = vld [vmem:[#allocation7 + $0x34] ss:$8 sps:$4 sm:$0xff]  }
  0xab   :  { %681 = vmatprep.subr.bf16.mxu1 %v3096_v6 }
  0xad   :  { %2236 = vmatpush3.bf16.msra.mxu0 %v2317_v7  ;;  %v3098_v7 = vld [vmem:[#allocation7 + $0x30] ss:$8 sps:$4 sm:$0xff]  }
  0xae   :  { %2237 = vmatprep.subr.bf16.mxu0 %v2318_v8  ;;  %682 = vmatpush1.bf16.msra.mxu1 %v3098_v7  ;;  %v3102_v8 = vld [vmem:[#allocation7 + $0x44] ss:$8 sps:$4 sm:$0xff]  }
  0xaf   :  { %683 = vmatprep.subr.bf16.mxu1 %v3102_v8 }
  0xb0   :  { %368 = vmatmul.mubr.bf16.gmra.mrb[8].mxu0 %v205_v35 }
  0xb1   :  { %375 = vmatprep.mubr.bf16.mxu0 %v208_v36  ;;  %2238 = vmatpush3.bf16.msra.mxu0 %v2319_v9  ;;  %v3104_v9 = vld [vmem:[#allocation7 + $0x40] ss:$8 sps:$4 sm:$0xff]  }
  0xb2   :  { %2239 = vmatprep.subr.bf16.mxu0 %v2320_v10  ;;  %684 = vmatpush1.bf16.msra.mxu1 %v3104_v9  ;;  %v3108_v10 = vld [vmem:[#allocation7 + $0x54] ss:$8 sps:$4 sm:$0xff]  }
  0xb3   :  { %685 = vmatprep.subr.bf16.mxu1 %v3108_v10 }
  0xb5   :  { %2240 = vmatpush3.bf16.msra.mxu0 %v2321_v14  ;;  %v3120_v14 = vld [vmem:[#allocation7 + $0x74] ss:$8 sps:$4 sm:$0xff]  }
  0xb6   :  { %2241 = vmatprep.subr.bf16.mxu0 %v2322_v15  ;;  %686 = vmatpush1.bf16.msra.mxu1 %v3110_v11  ;;  %v3122_v15 = vld [vmem:[#allocation7 + $0x70] ss:$8 sps:$4 sm:$0xff]  }
  0xb7   :  { %687 = vmatprep.subr.bf16.mxu1 %v3114_v12 }
  0xb8   :  { %376 = vmatmul.mubr.bf16.gmra.mrb[12].mxu0 %v207_v41 }
  0xb9   :  { %383 = vmatprep.mubr.bf16.mxu0 %v210_v42  ;;  %2242 = vmatpush3.bf16.msra.mxu0 %v2323_v16  ;;  %v2934_v16 = vmov 0  }
  0xba   :  { %2243 = vmatprep.subr.bf16.mxu0 %v2324_v17  ;;  %688 = vmatpush1.bf16.msra.mxu1 %v3116_v13 }
  0xbb   :  { %689 = vmatprep.subr.bf16.mxu1 %v3120_v14  ;;  %707 = vmatprep.mubr.bf16.mxu1 %v2934_v16 }
  0xbd   :  { %2244 = vmatpush3.bf16.msra.mxu0 %v2325_v18  ;;  %v3127_v18 = vld [vmem:[#allocation8] ss:$0 sm:$0xff] }
  0xbe   :  { %690 = vmatpush1.bf16.msra.mxu1 %v3122_v15 }
  0xbf   :  { %1390 = vmatprep.subr.bf16.mxu1 %v2326_v0 }
  0xc0   :  { %384 = vmatmul.mubr.bf16.gmra.mrb[16].mxu0 %v209_v47 }
  0xc1   :  { %391 = vmatprep.mubr.bf16.mxu0 %v212_v48 }
  0xc8   :  { %392 = vmatmul.mubr.bf16.gmra.mrb[20].mxu0 %v211_v53 }
  0xc9   :  { %399 = vmatprep.mubr.bf16.mxu0 %v214_v54 }
  0xd0   :  { %400 = vmatmul.mubr.bf16.gmra.mrb[24].mxu0 %v213_v59 }
  0xd1   :  { %407 = vmatprep.mubr.bf16.mxu0 %v216_v60 }
  0xd8   :  { %408 = vmatmul.mubr.bf16.gmra.mrb[28].mxu0 %v215_v63 }
 0x173   :  { %v2181_v17 = vpop.f32.mrb[0].mxu0 }
 0x174   :  { %v2182_v19 = vpop.f32.mrb[1].mxu0 }
 0x175   :  { %v2183_v20 = vadd.f32 %v2182_v19, %v2181_v17  ;;  %v2184_v21 = vpop.f32.mrb[2].mxu0  ;;  %v512_v19 = vld [vmem:[#allocation11] sm:$0xff] }
 0x176   :  { %v2185_v22 = vpop.f32.mrb[3].mxu0 }
 0x177   :  { %v354_v23 = vadd.f32 %v2183_v20, %v3127_v18  ;;  %v2186_v24 = vadd.f32 %v2185_v22, %v2184_v21  ;;  %v513_v20 = vld [vmem:[#allocation11 + $0x8] sm:$0xff] }
 0x179   :  { %v1893_v25 = vmul.f32 -1.442695, %v354_v23  ;;  %v357_v26 = vadd.f32 %v2186_v24, %v3127_v18 }
 0x17b   :  { %2350 = vpow2.f32 %v1893_v25  ;;  %v1894_v27 = vmul.f32 -1.442695, %v357_v26  ;;  %v2187_v28 = vpop.f32.mrb[4].mxu0 }
 0x17c   :  { %v2188_v29 = vpop.f32.mrb[5].mxu0 }
 0x17d   :  { %2352 = vpow2.f32 %v1894_v27  ;;  %v2189_v30 = vadd.f32 %v2188_v29, %v2187_v28  ;;  %v2190_v31 = vpop.f32.mrb[6].mxu0 }
 0x17e   :  { %v2191_v32 = vpop.f32.mrb[7].mxu0 }
 0x17f   :  { %v362_v33 = vadd.f32 %v2189_v30, %v3127_v18  ;;  %v2192_v34 = vadd.f32 %v2191_v32, %v2190_v31 }
 0x181   :  { %v1895_v35 = vmul.f32 -1.442695, %v362_v33  ;;  %v365_v36 = vadd.f32 %v2192_v34, %v3127_v18  ;;  %v2935_v33 = vmov 1.0|1.0  }
 0x183   :  { %2354 = vpow2.f32 %v1895_v35  ;;  %v1896_v37 = vmul.f32 -1.442695, %v365_v36  ;;  %v2193_v38 = vpop.f32.mrb[8].mxu0 }
 0x184   :  { %v2194_v39 = vpop.f32.mrb[9].mxu0 }
 0x185   :  { %v2351_v40 = vpop.eup %2350  ;;  %2356 = vpow2.f32 %v1896_v37  ;;  %v2195_v41 = vadd.f32 %v2194_v39, %v2193_v38  ;;  %v2196_v42 = vpop.f32.mrb[10].mxu0  ;;  %v514_v38 = vld [vmem:[#allocation11 + $0x10] sm:$0xff]  ;;  %v515_v39 = vld [vmem:[#allocation11 + $0x18] sm:$0xff] }
 0x186   :  { %v464_v43 = vadd.f32 1.0, %v2351_v40  ;;  %v2197_v44 = vpop.f32.mrb[11].mxu0 }
 0x187   :  { %v2353_v45 = vpop.eup %2352  ;;  %v370_v46 = vadd.f32 %v2195_v41, %v3127_v18  ;;  %v2198_v47 = vadd.f32 %v2197_v44, %v2196_v42 }
 0x188   :  { %2358 = vrcp.f32 %v464_v43  ;;  %v465_v48 = vadd.f32 1.0, %v2353_v45 }
 0x189   :  { %v1897_v49 = vmul.f32 -1.442695, %v370_v46  ;;  %v373_v50 = vadd.f32 %v2198_v47, %v3127_v18 }
 0x18a   :  { %2360 = vrcp.f32 %v465_v48 }
 0x18b   :  { %2362 = vpow2.f32 %v1897_v49  ;;  %v1898_v51 = vmul.f32 -1.442695, %v373_v50  ;;  %v2199_v52 = vpop.f32.mrb[12].mxu0 }
 0x18c   :  { %v2200_v53 = vpop.f32.mrb[13].mxu0 }
 0x18d   :  { %v2355_v54 = vpop.eup %2354  ;;  %2364 = vpow2.f32 %v1898_v51  ;;  %v2201_v55 = vadd.f32 %v2200_v53, %v2199_v52  ;;  %v2202_v56 = vpop.f32.mrb[14].mxu0  ;;  %v516_v52 = vld [vmem:[#allocation11 + $0x20] sm:$0xff]  ;;  %v517_v53 = vld [vmem:[#allocation11 + $0x28] sm:$0xff] }
 0x18e   :  { %v466_v57 = vadd.f32 1.0, %v2355_v54  ;;  %v2203_v58 = vpop.f32.mrb[15].mxu0 }
 0x18f   :  { %v2357_v59 = vpop.eup %2356  ;;  %v378_v60 = vadd.f32 %v2201_v55, %v3127_v18  ;;  %v2204_v61 = vadd.f32 %v2203_v58, %v2202_v56 }
 0x190   :  { %2366 = vrcp.f32 %v466_v57  ;;  %v467_v62 = vadd.f32 1.0, %v2357_v59 }
 0x191   :  { %v1899_v63 = vmul.f32 -1.442695, %v378_v60  ;;  %v381_v0 = vadd.f32 %v2204_v61, %v3127_v18 }
 0x192   :  { %v2359_v17 = vpop.eup %2358  ;;  %2368 = vrcp.f32 %v467_v62 }
 0x193   :  { %2370 = vpow2.f32 %v1899_v63  ;;  %v1900_v21 = vmul.f32 -1.442695, %v381_v0  ;;  %v2205_v22 = vpop.f32.mrb[16].mxu0  ;;  %vm528_vm0 = vcmp.lt.f32.partialorder %v512_v19, %v2359_v17  ;;  %v518_v19 = vld [vmem:[#allocation11 + $0x30] sm:$0xff] }
 0x194   :  { %v2361_v23 = vpop.eup %2360  ;;  %v2206_v24 = vpop.f32.mrb[17].mxu0 }
 0x195   :  { %v2363_v25 = vpop.eup %2362  ;;  %2372 = vpow2.f32 %v1900_v21  ;;  %v2207_v26 = vadd.f32 %v2206_v24, %v2205_v22  ;;  %v2208_v27 = vpop.f32.mrb[18].mxu0  ;;  %vm529_vm1 = vcmp.lt.f32.partialorder %v513_v20, %v2361_v23  ;;  %v519_v20 = vld [vmem:[#allocation11 + $0x38] sm:$0xff] }
 0x196   :  { %v468_v28 = vadd.f32 1.0, %v2363_v25  ;;  %v2209_v29 = vpop.f32.mrb[19].mxu0  ;;  %vm1941_vm2 = vmpackc.low %vm529_vm1, %vm528_vm0 }
 0x197   :  { %v2365_v30 = vpop.eup %2364  ;;  %v386_v31 = vadd.f32 %v2207_v26, %v3127_v18  ;;  %v2210_v32 = vadd.f32 %v2209_v29, %v2208_v27  ;;  %1942 = vmatmul.mubr.msk.bf16.vlgmr.msra.gmra.mrb[0].mxu1 %vm1941_vm2, %v2935_v33 }
 0x198   :  { %2374 = vrcp.f32 %v468_v28  ;;  %v469_v34 = vadd.f32 1.0, %v2365_v30  ;;  %717 = vmatprep.mubr.bf16.mxu1 %v2934_v16  ;;  %1391 = vmatpush1.bf16.msra.mxu1 %v3081_v1 }
 0x199   :  { %v1901_v35 = vmul.f32 -1.442695, %v386_v31  ;;  %v389_v36 = vadd.f32 %v2210_v32, %v3127_v18  ;;  %1392 = vmatprep.subr.bf16.mxu1 %v3084_v2 }
 0x19a   :  { %v2367_v37 = vpop.eup %2366  ;;  %2376 = vrcp.f32 %v469_v34  ;;  %v520_v34 = vld [vmem:[#allocation11 + $0x40] sm:$0xff] }
 0x19b   :  { %2378 = vpow2.f32 %v1901_v35  ;;  %v1902_v40 = vmul.f32 -1.442695, %v389_v36  ;;  %v2211_v41 = vpop.f32.mrb[20].mxu0  ;;  %vm530_vm3 = vcmp.lt.f32.partialorder %v514_v38, %v2367_v37  ;;  %v521_v35 = vld [vmem:[#allocation11 + $0x48] sm:$0xff] }
 0x19c   :  { %v2369_v42 = vpop.eup %2368  ;;  %v2212_v43 = vpop.f32.mrb[21].mxu0  ;;  %1393 = vmatpush1.bf16.msra.mxu1 %v3086_v3 }
 0x19d   :  { %v2371_v44 = vpop.eup %2370  ;;  %2380 = vpow2.f32 %v1902_v40  ;;  %v2213_v45 = vadd.f32 %v2212_v43, %v2211_v41  ;;  %v2214_v1 = vpop.f32.mrb[22].mxu0  ;;  %vm531_vm4 = vcmp.lt.f32.partialorder %v515_v39, %v2369_v42  ;;  %1394 = vmatprep.subr.bf16.mxu1 %v3090_v4  ;;  %v522_v40 = vld [vmem:[#allocation11 + $0x50] sm:$0xff]  ;;  %v523_v41 = vld [vmem:[#allocation11 + $0x58] sm:$0xff] }
 0x19e   :  { %v470_v2 = vadd.f32 1.0, %v2371_v44  ;;  %v2215_v46 = vpop.f32.mrb[23].mxu0  ;;  %vm1943_vm5 = vmpackc.low %vm531_vm4, %vm530_vm3 }
 0x19f   :  { %v2373_v47 = vpop.eup %2372  ;;  %v394_v48 = vadd.f32 %v2213_v45, %v3127_v18  ;;  %v2216_v49 = vadd.f32 %v2215_v46, %v2214_v1  ;;  %1944 = vmatmul.mubr.msk.bf16.gmra.mrb[4].mxu1 %vm1943_vm5, %v2935_v33  ;;  %v525_v46 = vld [vmem:[#allocation11 + $0x68] sm:$0xff] }
 0x1a0   :  { %2382 = vrcp.f32 %v470_v2  ;;  %v471_v50 = vadd.f32 1.0, %v2373_v47  ;;  %727 = vmatprep.mubr.bf16.mxu1 %v2934_v16  ;;  %1395 = vmatpush1.bf16.msra.mxu1 %v3092_v5  ;;  %v524_v2 = vld [vmem:[#allocation11 + $0x60] sm:$0xff] }
 0x1a1   :  { %v1903_v3 = vmul.f32 -1.442695, %v394_v48  ;;  %v397_v51 = vadd.f32 %v2216_v49, %v3127_v18  ;;  %1396 = vmatprep.subr.bf16.mxu1 %v3096_v6  ;;  %v526_v49 = vld [vmem:[#allocation11 + $0x70] sm:$0xff] }
 0x1a2   :  { %v2375_v4 = vpop.eup %2374  ;;  %2384 = vrcp.f32 %v471_v50  ;;  %v527_v50 = vld [vmem:[#allocation11 + $0x78] sm:$0xff] }
 0x1a3   :  { %2386 = vpow2.f32 %v1903_v3  ;;  %v1904_v54 = vmul.f32 -1.442695, %v397_v51  ;;  %v2217_v55 = vpop.f32.mrb[24].mxu0  ;;  %vm532_vm6 = vcmp.lt.f32.partialorder %v516_v52, %v2375_v4  ;;  %v585_v51 = vlaneseq }
 0x1a4   :  { %v2377_v56 = vpop.eup %2376  ;;  %v2218_v57 = vpop.f32.mrb[25].mxu0  ;;  %1397 = vmatpush1.bf16.msra.mxu1 %v3098_v7 }
 0x1a5   :  { %v2379_v58 = vpop.eup %2378  ;;  %2388 = vpow2.f32 %v1904_v54  ;;  %v2219_v59 = vadd.f32 %v2218_v57, %v2217_v55  ;;  %v2220_v5 = vpop.f32.mrb[26].mxu0  ;;  %vm533_vm7 = vcmp.lt.f32.partialorder %v517_v53, %v2377_v56  ;;  %1398 = vmatprep.subr.bf16.mxu1 %v3102_v8  ;;  %v586_v4 = vshrl.u32 %v585_v51, 7  ;;  %v168_v53 = vld [vmem:[#allocation10] sm:$0x3] }
 0x1a6   :  { %v472_v6 = vadd.f32 1.0, %v2379_v58  ;;  %v2221_v60 = vpop.f32.mrb[27].mxu0  ;;  %vm1945_vm8 = vmpackc.low %vm533_vm7, %vm532_vm6 }
 0x1a7   :  { %v2381_v61 = vpop.eup %2380  ;;  %v402_v62 = vadd.f32 %v2219_v59, %v3127_v18  ;;  %v2222_v63 = vadd.f32 %v2221_v60, %v2220_v5  ;;  %1946 = vmatmul.mubr.msk.bf16.gmra.mrb[8].mxu1 %vm1945_vm8, %v2935_v33  ;;  %v587_v52 = vsub.s32 0, %v586_v4  ;;  %v591_v54 = vsub.s32 1, %v586_v4 }
 0x1a8   :  { %2390 = vrcp.f32 %v472_v6  ;;  %v473_v0 = vadd.f32 1.0, %v2381_v61  ;;  %737 = vmatprep.mubr.bf16.mxu1 %v2934_v16  ;;  %1399 = vmatpush1.bf16.msra.mxu1 %v3104_v9 }
 0x1a9   :  { %v1905_v7 = vmul.f32 -1.442695, %v402_v62  ;;  %v405_v17 = vadd.f32 %v2222_v63, %v3127_v18  ;;  %1400 = vmatprep.subr.bf16.mxu1 %v3108_v10  ;;  %v3176_v55 = vrot.slane %v168_v53, %v587_v52  ;;  %v3178_v56 = vrot.slane %v168_v53, %v591_v54 }
 0x1aa   :  { %v2383_v8 = vpop.eup %2382  ;;  %2392 = vrcp.f32 %v473_v0 }
 0x1ab   :  { %2394 = vpow2.f32 %v1905_v7  ;;  %v1906_v21 = vmul.f32 -1.442695, %v405_v17  ;;  %v2223_v22 = vpop.f32.mrb[28].mxu0  ;;  %vm534_vm9 = vcmp.lt.f32.partialorder %v518_v19, %v2383_v8 }
 0x1ac   :  { %v2385_v23 = vpop.eup %2384  ;;  %v2224_v24 = vpop.f32.mrb[29].mxu0  ;;  %1401 = vmatpush1.bf16.msra.mxu1 %v3110_v11 }
 0x1ad   :  { %v2387_v25 = vpop.eup %2386  ;;  %2396 = vpow2.f32 %v1906_v21  ;;  %v2225_v26 = vadd.f32 %v2224_v24, %v2223_v22  ;;  %v2226_v9 = vpop.f32.mrb[30].mxu0  ;;  %vm535_vm10 = vcmp.lt.f32.partialorder %v519_v20, %v2385_v23  ;;  %1402 = vmatprep.subr.bf16.mxu1 %v3114_v12 }
 0x1ae   :  { %v474_v10 = vadd.f32 1.0, %v2387_v25  ;;  %v2227_v27 = vpop.f32.mrb[31].mxu0  ;;  %vm1947_vm11 = vmpackc.low %vm535_vm10, %vm534_vm9 }
 0x1af   :  { %v2389_v28 = vpop.eup %2388  ;;  %v410_v29 = vadd.f32 %v2225_v26, %v3127_v18  ;;  %v2228_v30 = vadd.f32 %v2227_v27, %v2226_v9  ;;  %1948 = vmatmul.mubr.msk.bf16.gmra.mrb[12].mxu1 %vm1947_vm11, %v2935_v33 }
 0x1b0   :  { %2398 = vrcp.f32 %v474_v10  ;;  %v475_v31 = vadd.f32 1.0, %v2389_v28  ;;  %747 = vmatprep.mubr.bf16.mxu1 %v2934_v16  ;;  %1403 = vmatpush1.bf16.msra.mxu1 %v3116_v13 }
 0x1b1   :  { %v1907_v11 = vmul.f32 -1.442695, %v410_v29  ;;  %v413_v32 = vadd.f32 %v2228_v30, %v3127_v18  ;;  %1404 = vmatprep.subr.bf16.mxu1 %v3120_v14 }
 0x1b2   :  { %v2391_v12 = vpop.eup %2390  ;;  %2400 = vrcp.f32 %v475_v31 }
 0x1b3   :  { %2402 = vpow2.f32 %v1907_v11  ;;  %v1908_v36 = vmul.f32 -1.442695, %v413_v32  ;;  %vm536_vm12 = vcmp.lt.f32.partialorder %v520_v34, %v2391_v12 }
 0x1b4   :  { %v2393_v37 = vpop.eup %2392  ;;  %1405 = vmatpush1.bf16.msra.mxu1 %v3122_v15 }
 0x1b5   :  { %v2395_v38 = vpop.eup %2394  ;;  %2404 = vpow2.f32 %v1908_v36  ;;  %vm537_vm13 = vcmp.lt.f32.partialorder %v521_v35, %v2393_v37 }
 0x1b6   :  { %v476_v39 = vadd.f32 1.0, %v2395_v38  ;;  %vm1949_vm14 = vmpackc.low %vm537_vm13, %vm536_vm12 }
 0x1b7   :  { %v2397_v13 = vpop.eup %2396  ;;  %1950 = vmatmul.mubr.msk.bf16.gmra.mrb[16].mxu1 %vm1949_vm14, %v2935_v33 }
 0x1b8   :  { %2406 = vrcp.f32 %v476_v39  ;;  %v477_v14 = vadd.f32 1.0, %v2397_v13  ;;  %757 = vmatprep.mubr.bf16.mxu1 %v2934_v16 }
 0x1ba   :  { %v2399_v18 = vpop.eup %2398  ;;  %2408 = vrcp.f32 %v477_v14 }
 0x1bb   :  { %vm538_vm15 = vcmp.lt.f32.partialorder %v522_v40, %v2399_v18 }
 0x1bc   :  { %v2401_v42 = vpop.eup %2400 }
 0x1bd   :  { %v2403_v43 = vpop.eup %2402  ;;  %vm539_vm0 = vcmp.lt.f32.partialorder %v523_v41, %v2401_v42 }
 0x1be   :  { %v478_v15 = vadd.f32 1.0, %v2403_v43  ;;  %vm1951_vm1 = vmpackc.low %vm539_vm0, %vm538_vm15 }
 0x1bf   :  { %v2405_v44 = vpop.eup %2404  ;;  %1952 = vmatmul.mubr.msk.bf16.gmra.mrb[20].mxu1 %vm1951_vm1, %v2935_v33 }
 0x1c0   :  { %2410 = vrcp.f32 %v478_v15  ;;  %v479_v45 = vadd.f32 1.0, %v2405_v44  ;;  %767 = vmatprep.mubr.bf16.mxu1 %v2934_v16 }
 0x1c2   :  { %v2407_v1 = vpop.eup %2406  ;;  %2412 = vrcp.f32 %v479_v45 }
 0x1c3   :  { %vm540_vm2 = vcmp.lt.f32.partialorder %v524_v2, %v2407_v1 }
 0x1c4   :  { %v2409_v47 = vpop.eup %2408 }
 0x1c5   :  { %vm541_vm3 = vcmp.lt.f32.partialorder %v525_v46, %v2409_v47 }
 0x1c6   :  { %vm1953_vm4 = vmpackc.low %vm541_vm3, %vm540_vm2 }
 0x1c7   :  { %1954 = vmatmul.mubr.msk.bf16.gmra.mrb[24].mxu1 %vm1953_vm4, %v2935_v33 }
 0x1c8   :  { %777 = vmatprep.mubr.bf16.mxu1 %v2934_v16 }
 0x1ca   :  { %v2411_v48 = vpop.eup %2410 }
 0x1cb   :  { %vm542_vm5 = vcmp.lt.f32.partialorder %v526_v49, %v2411_v48 }
 0x1cc   :  { %v2413_v3 = vpop.eup %2412 }
 0x1cd   :  { %vm543_vm6 = vcmp.lt.f32.partialorder %v527_v50, %v2413_v3 }
 0x1ce   :  { %vm1955_vm7 = vmpackc.low %vm543_vm6, %vm542_vm5 }
 0x1cf   :  { %1956 = vmatmul.mubr.msk.bf16.gmra.mrb[28].mxu1 %vm1955_vm7, %v2935_v33 }
 0x1d0   :  { %1422 = vmatprep.mubr.bf16.mxu1 %v2934_v16 }
 0x26a   :  { %v709_v57 = vpop.f32.mrb[0].mxu1 }
 0x26b   :  { %v710_v58 = vadd.f32 %v709_v57, %v3176_v55  ;;  %v711_v59 = vpop.f32.mrb[1].mxu1 }
 0x26c   :  { %v712_v5 = vadd.f32 %v711_v59, %v3178_v56  ;;  %v713_v6 = vpop.f32.mrb[2].mxu1 }
 0x26d   :  { %v1957_v60 = vmul.f32 -1.442695, %v710_v58  ;;  %v714_v61 = vadd.f32 %v713_v6, %v3176_v55  ;;  %v715_v62 = vpop.f32.mrb[3].mxu1  ;;  %v982_v6 = vld [vmem:[#allocation13 + $0x10] sm:$0xff] }
 0x26e   :  { %v1958_v63 = vmul.f32 -1.442695, %v712_v5  ;;  %v716_v0 = vadd.f32 %v715_v62, %v3178_v56  ;;  %v980_v5 = vld [vmem:[#allocation13] sm:$0xff]  ;;  %v981_v62 = vld [vmem:[#allocation13 + $0x8] sm:$0xff] }
 0x26f   :  { %2414 = vpow2.f32 %v1957_v60  ;;  %v1959_v7 = vmul.f32 -1.442695, %v714_v61 }
 0x270   :  { %2416 = vpow2.f32 %v1958_v63  ;;  %v1960_v17 = vmul.f32 -1.442695, %v716_v0  ;;  %v983_v63 = vld [vmem:[#allocation13 + $0x18] sm:$0xff] }
 0x271   :  { %2418 = vpow2.f32 %v1959_v7 }
 0x272   :  { %2420 = vpow2.f32 %v1960_v17  ;;  %v719_v8 = vpop.f32.mrb[4].mxu1 }
 0x273   :  { %v720_v19 = vadd.f32 %v719_v8, %v3176_v55  ;;  %v721_v20 = vpop.f32.mrb[5].mxu1 }
 0x274   :  { %v722_v21 = vadd.f32 %v721_v20, %v3178_v56  ;;  %v723_v22 = vpop.f32.mrb[6].mxu1 }
 0x275   :  { %v1961_v23 = vmul.f32 -1.442695, %v720_v19  ;;  %v724_v24 = vadd.f32 %v723_v22, %v3176_v55  ;;  %v725_v25 = vpop.f32.mrb[7].mxu1 }
 0x276   :  { %v1962_v26 = vmul.f32 -1.442695, %v722_v21  ;;  %v726_v9 = vadd.f32 %v725_v25, %v3178_v56 }
 0x277   :  { %2422 = vpow2.f32 %v1961_v23  ;;  %v1963_v10 = vmul.f32 -1.442695, %v724_v24 }
 0x278   :  { %2424 = vpow2.f32 %v1962_v26  ;;  %v1964_v27 = vmul.f32 -1.442695, %v726_v9 }
 0x279   :  { %v2415_v28 = vpop.eup %2414  ;;  %2426 = vpow2.f32 %v1963_v10 }
 0x27a   :  { %v2417_v29 = vpop.eup %2416  ;;  %v884_v30 = vadd.f32 1.0, %v2415_v28  ;;  %2428 = vpow2.f32 %v1964_v27  ;;  %v729_v31 = vpop.f32.mrb[8].mxu1 }
 0x27b   :  { %v2419_v11 = vpop.eup %2418  ;;  %v885_v32 = vadd.f32 1.0, %v2417_v29  ;;  %v730_v12 = vadd.f32 %v729_v31, %v3176_v55  ;;  %v731_v34 = vpop.f32.mrb[9].mxu1 }
 0x27c   :  { %v2421_v35 = vpop.eup %2420  ;;  %2430 = vrcp.f32 %v884_v30  ;;  %v886_v36 = vadd.f32 1.0, %v2419_v11  ;;  %v732_v37 = vadd.f32 %v731_v34, %v3178_v56  ;;  %v733_v38 = vpop.f32.mrb[10].mxu1 }
 0x27d   :  { %2432 = vrcp.f32 %v885_v32  ;;  %v887_v39 = vadd.f32 1.0, %v2421_v35  ;;  %v1965_v13 = vmul.f32 -1.442695, %v730_v12  ;;  %v734_v14 = vadd.f32 %v733_v38, %v3176_v55  ;;  %v735_v18 = vpop.f32.mrb[11].mxu1  ;;  %v984_v35 = vld [vmem:[#allocation13 + $0x20] sm:$0xff] }
 0x27e   :  { %2434 = vrcp.f32 %v886_v36  ;;  %v1966_v40 = vmul.f32 -1.442695, %v732_v37  ;;  %v736_v41 = vadd.f32 %v735_v18, %v3178_v56  ;;  %v986_v36 = vld [vmem:[#allocation13 + $0x30] sm:$0xff] }
 0x27f   :  { %2436 = vrcp.f32 %v887_v39  ;;  %v1967_v42 = vmul.f32 -1.442695, %v734_v14  ;;  %v985_v39 = vld [vmem:[#allocation13 + $0x28] sm:$0xff] }
 0x280   :  { %2438 = vpow2.f32 %v1965_v13  ;;  %v1968_v43 = vmul.f32 -1.442695, %v736_v41  ;;  %v987_v13 = vld [vmem:[#allocation13 + $0x38] sm:$0xff] }
 0x281   :  { %v2423_v15 = vpop.eup %2422  ;;  %2440 = vpow2.f32 %v1966_v40 }
 0x282   :  { %v2425_v44 = vpop.eup %2424  ;;  %v888_v45 = vadd.f32 1.0, %v2423_v15  ;;  %2442 = vpow2.f32 %v1967_v42  ;;  %v739_v1 = vpop.f32.mrb[12].mxu1 }
 0x283   :  { %v2427_v2 = vpop.eup %2426  ;;  %v889_v46 = vadd.f32 1.0, %v2425_v44  ;;  %2444 = vpow2.f32 %v1968_v43  ;;  %v740_v47 = vadd.f32 %v739_v1, %v3176_v55  ;;  %v741_v48 = vpop.f32.mrb[13].mxu1 }
 0x284   :  { %v2429_v49 = vpop.eup %2428  ;;  %2446 = vrcp.f32 %v888_v45  ;;  %v890_v50 = vadd.f32 1.0, %v2427_v2  ;;  %v742_v3 = vadd.f32 %v741_v48, %v3178_v56  ;;  %v743_v51 = vpop.f32.mrb[14].mxu1 }
 0x285   :  { %2448 = vrcp.f32 %v889_v46  ;;  %v891_v4 = vadd.f32 1.0, %v2429_v49  ;;  %v1969_v52 = vmul.f32 -1.442695, %v740_v47  ;;  %v744_v53 = vadd.f32 %v743_v51, %v3176_v55  ;;  %v745_v54 = vpop.f32.mrb[15].mxu1 }
 0x286   :  { %v2431_v57 = vpop.eup %2430  ;;  %2450 = vrcp.f32 %v890_v50  ;;  %v1970_v58 = vmul.f32 -1.442695, %v742_v3  ;;  %v746_v59 = vadd.f32 %v745_v54, %v3178_v56 }
 0x287   :  { %v2433_v60 = vpop.eup %2432  ;;  %2452 = vrcp.f32 %v891_v4  ;;  %v1971_v61 = vmul.f32 -1.442695, %v744_v53  ;;  %vm1012_vm8 = vcmp.lt.f32.partialorder %v980_v5, %v2431_v57  ;;  %v990_v5 = vld [vmem:[#allocation13 + $0x50] sm:$0xff] }
 0x288   :  { %v2435_v0 = vpop.eup %2434  ;;  %2454 = vpow2.f32 %v1969_v52  ;;  %v1972_v7 = vmul.f32 -1.442695, %v746_v59  ;;  %vm1013_vm10 = vcmp.lt.f32.partialorder %v981_v62, %v2433_v60  ;;  %v988_v59 = vld [vmem:[#allocation13 + $0x40] sm:$0xff]  ;;  %v991_v62 = vld [vmem:[#allocation13 + $0x58] sm:$0xff] }
 0x289   :  { %v2437_v17 = vpop.eup %2436  ;;  %2456 = vpow2.f32 %v1970_v58  ;;  %vm1014_vm9 = vcmp.lt.f32.partialorder %v982_v6, %v2435_v0 }
 0x28a   :  { %v2439_v8 = vpop.eup %2438  ;;  %2458 = vpow2.f32 %v1971_v61  ;;  %v749_v19 = vpop.f32.mrb[16].mxu1  ;;  %vm1015_vm11 = vcmp.lt.f32.partialorder %v983_v63, %v2437_v17  ;;  %vm3196_vm12 = vmpackc.low %vm1014_vm9, %vm1012_vm8  ;;  %v989_v61 = vld [vmem:[#allocation13 + $0x48] sm:$0xff] }
 0x28b   :  { %v2441_v21 = vpop.eup %2440  ;;  %v892_v22 = vadd.f32 1.0, %v2439_v8  ;;  %2460 = vpow2.f32 %v1972_v7  ;;  %v750_v23 = vadd.f32 %v749_v19, %v3176_v55  ;;  %v751_v24 = vpop.f32.mrb[17].mxu1  ;;  %vm2021_vm13 = vmpackc.low %vm1015_vm11, %vm1013_vm10 }
 0x28c   :  { %v2443_v25 = vpop.eup %2442  ;;  %v893_v26 = vadd.f32 1.0, %v2441_v21  ;;  %v752_v9 = vadd.f32 %v751_v24, %v3178_v56  ;;  %v753_v10 = vpop.f32.mrb[18].mxu1  ;;  %2022 = vmatprep.mubr.msk.bf16.mxu0 %vm2021_vm13, %v2935_v33 }
 0x28d   :  { %v2445_v27 = vpop.eup %2444  ;;  %2462 = vrcp.f32 %v892_v22  ;;  %v894_v28 = vadd.f32 1.0, %v2443_v25  ;;  %v1973_v29 = vmul.f32 -1.442695, %v750_v23  ;;  %v754_v30 = vadd.f32 %v753_v10, %v3176_v55  ;;  %v755_v31 = vpop.f32.mrb[19].mxu1  ;;  %2024 = vmatmul.mubr.msk.bf16.vlgmr.msra.gmra.mrb[32].mxu0 %vm3196_vm12, %v2935_v33 }
 0x28e   :  { %v2447_v11 = vpop.eup %2446  ;;  %2464 = vrcp.f32 %v893_v26  ;;  %v895_v32 = vadd.f32 1.0, %v2445_v27  ;;  %v1974_v12 = vmul.f32 -1.442695, %v752_v9  ;;  %v756_v34 = vadd.f32 %v755_v31, %v3178_v56 }
 0x28f   :  { %v2449_v37 = vpop.eup %2448  ;;  %2466 = vrcp.f32 %v894_v28  ;;  %v1975_v38 = vmul.f32 -1.442695, %v754_v30  ;;  %vm1016_vm14 = vcmp.lt.f32.partialorder %v984_v35, %v2447_v11 }
 0x290   :  { %v2451_v14 = vpop.eup %2450  ;;  %2468 = vrcp.f32 %v895_v32  ;;  %v1976_v18 = vmul.f32 -1.442695, %v756_v34  ;;  %vm1017_vm0 = vcmp.lt.f32.partialorder %v985_v39, %v2449_v37  ;;  %v994_v34 = vld [vmem:[#allocation13 + $0x70] sm:$0xff]  ;;  %v993_v37 = vld [vmem:[#allocation13 + $0x68] sm:$0xff] }
 0x291   :  { %v2453_v40 = vpop.eup %2452  ;;  %2470 = vpow2.f32 %v1973_v29  ;;  %vm1018_vm15 = vcmp.lt.f32.partialorder %v986_v36, %v2451_v14 }
 0x292   :  { %v2455_v41 = vpop.eup %2454  ;;  %2472 = vpow2.f32 %v1974_v12  ;;  %v759_v42 = vpop.f32.mrb[20].mxu1  ;;  %vm1019_vm1 = vcmp.lt.f32.partialorder %v987_v13, %v2453_v40  ;;  %vm3208_vm2 = vmpackc.low %vm1018_vm15, %vm1016_vm14  ;;  %v992_v12 = vld [vmem:[#allocation13 + $0x60] sm:$0xff] }
 0x293   :  { %v2457_v15 = vpop.eup %2456  ;;  %v896_v44 = vadd.f32 1.0, %v2455_v41  ;;  %2474 = vpow2.f32 %v1975_v38  ;;  %v760_v45 = vadd.f32 %v759_v42, %v3176_v55  ;;  %v761_v1 = vpop.f32.mrb[21].mxu1  ;;  %vm2025_vm3 = vmpackc.low %vm1019_vm1, %vm1017_vm0  ;;  %v995_v38 = vld [vmem:[#allocation13 + $0x78] sm:$0xff] }
 0x294   :  { %v2459_v2 = vpop.eup %2458  ;;  %v897_v46 = vadd.f32 1.0, %v2457_v15  ;;  %2476 = vpow2.f32 %v1976_v18  ;;  %v762_v47 = vadd.f32 %v761_v1, %v3178_v56  ;;  %v763_v48 = vpop.f32.mrb[22].mxu1  ;;  %2026 = vmatprep.mubr.msk.bf16.mxu0 %vm2025_vm3, %v2935_v33 }
 0x295   :  { %v2461_v49 = vpop.eup %2460  ;;  %2478 = vrcp.f32 %v896_v44  ;;  %v898_v50 = vadd.f32 1.0, %v2459_v2  ;;  %v1977_v3 = vmul.f32 -1.442695, %v760_v45  ;;  %v764_v51 = vadd.f32 %v763_v48, %v3176_v55  ;;  %v765_v4 = vpop.f32.mrb[23].mxu1  ;;  %2028 = vmatmul.mubr.msk.bf16.gmra.mrb[36].mxu0 %vm3208_vm2, %v2935_v33 }
 0x296   :  { %2480 = vrcp.f32 %v897_v46  ;;  %v899_v52 = vadd.f32 1.0, %v2461_v49  ;;  %v1978_v53 = vmul.f32 -1.442695, %v762_v47  ;;  %v766_v54 = vadd.f32 %v765_v4, %v3178_v56 }
 0x297   :  { %v2463_v57 = vpop.eup %2462  ;;  %2482 = vrcp.f32 %v898_v50  ;;  %v1979_v58 = vmul.f32 -1.442695, %v764_v51 }
 0x298   :  { %v2465_v6 = vpop.eup %2464  ;;  %2484 = vrcp.f32 %v899_v52  ;;  %v1980_v60 = vmul.f32 -1.442695, %v766_v54  ;;  %vm1020_vm4 = vcmp.lt.f32.partialorder %v988_v59, %v2463_v57  ;;  %v996_v57 = vld [vmem:[#allocation13 + $0x80] sm:$0xff] }
 0x299   :  { %v2467_v63 = vpop.eup %2466  ;;  %2486 = vpow2.f32 %v1977_v3  ;;  %vm1021_vm6 = vcmp.lt.f32.partialorder %v989_v61, %v2465_v6  ;;  %v997_v6 = vld [vmem:[#allocation13 + $0x88] sm:$0xff] }
 0x29a   :  { %v2469_v0 = vpop.eup %2468  ;;  %2488 = vpow2.f32 %v1978_v53  ;;  %v769_v7 = vpop.f32.mrb[24].mxu1  ;;  %vm1022_vm5 = vcmp.lt.f32.partialorder %v990_v5, %v2467_v63 }
 0x29b   :  { %v2471_v17 = vpop.eup %2470  ;;  %2490 = vpow2.f32 %v1979_v58  ;;  %v770_v8 = vadd.f32 %v769_v7, %v3176_v55  ;;  %v771_v19 = vpop.f32.mrb[25].mxu1  ;;  %vm1023_vm7 = vcmp.lt.f32.partialorder %v991_v62, %v2469_v0  ;;  %vm3221_vm8 = vmpackc.low %vm1022_vm5, %vm1020_vm4  ;;  %v998_v58 = vld [vmem:[#allocation13 + $0x90] sm:$0xff] }
 0x29c   :  { %v2473_v21 = vpop.eup %2472  ;;  %v900_v22 = vadd.f32 1.0, %v2471_v17  ;;  %2492 = vpow2.f32 %v1980_v60  ;;  %v772_v23 = vadd.f32 %v771_v19, %v3178_v56  ;;  %v773_v24 = vpop.f32.mrb[26].mxu1  ;;  %vm2029_vm9 = vmpackc.low %vm1023_vm7, %vm1021_vm6  ;;  %v999_v60 = vld [vmem:[#allocation13 + $0x98] sm:$0xff] }
 0x29d   :  { %v2475_v25 = vpop.eup %2474  ;;  %v901_v26 = vadd.f32 1.0, %v2473_v21  ;;  %v774_v9 = vadd.f32 %v773_v24, %v3176_v55  ;;  %2030 = vmatprep.mubr.msk.bf16.mxu0 %vm2029_vm9, %v2935_v33  ;;  %v775_v10 = vpop.f32.mrb[27].mxu1  ;;  %v1981_v29 = vmul.f32 -1.442695, %v770_v8  ;;  %v1002_v24 = vld [vmem:[#allocation13 + $0xb0] sm:$0xff] }
 0x29e   :  { %v2477_v27 = vpop.eup %2476  ;;  %2494 = vrcp.f32 %v900_v22  ;;  %v902_v28 = vadd.f32 1.0, %v2475_v25  ;;  %v776_v30 = vadd.f32 %v775_v10, %v3178_v56  ;;  %2032 = vmatmul.mubr.msk.bf16.gmra.mrb[40].mxu0 %vm3221_vm8, %v2935_v33  ;;  %v1982_v32 = vmul.f32 -1.442695, %v772_v23  ;;  %v1000_v23 = vld [vmem:[#allocation13 + $0xa0] sm:$0xff] }
 0x29f   :  { %v2479_v31 = vpop.eup %2478  ;;  %2496 = vrcp.f32 %v901_v26  ;;  %v903_v11 = vadd.f32 1.0, %v2477_v27  ;;  %v1983_v36 = vmul.f32 -1.442695, %v774_v9  ;;  %v1001_v26 = vld [vmem:[#allocation13 + $0xa8] sm:$0xff]  ;;  %v1003_v9 = vld [vmem:[#allocation13 + $0xb8] sm:$0xff] }
 0x2a0   :  { %v2481_v35 = vpop.eup %2480  ;;  %2498 = vrcp.f32 %v902_v28  ;;  %v1984_v13 = vmul.f32 -1.442695, %v776_v30  ;;  %vm1024_vm10 = vcmp.lt.f32.partialorder %v992_v12, %v2479_v31 }
 0x2a1   :  { %v2483_v39 = vpop.eup %2482  ;;  %2500 = vrcp.f32 %v903_v11  ;;  %vm1025_vm12 = vcmp.lt.f32.partialorder %v993_v37, %v2481_v35  ;;  %v1006_v37 = vld [vmem:[#allocation13 + $0xd0] sm:$0xff] }
 0x2a2   :  { %v2485_v14 = vpop.eup %2484  ;;  %2502 = vpow2.f32 %v1981_v29  ;;  %v779_v18 = vpop.f32.mrb[28].mxu1  ;;  %vm1026_vm11 = vcmp.lt.f32.partialorder %v994_v34, %v2483_v39  ;;  %v1005_v39 = vld [vmem:[#allocation13 + $0xc8] sm:$0xff] }
 0x2a3   :  { %v2487_v40 = vpop.eup %2486  ;;  %2504 = vpow2.f32 %v1982_v32  ;;  %v780_v41 = vadd.f32 %v779_v18, %v3176_v55  ;;  %v781_v42 = vpop.f32.mrb[29].mxu1  ;;  %vm1027_vm13 = vcmp.lt.f32.partialorder %v995_v38, %v2485_v14  ;;  %vm3233_vm14 = vmpackc.low %vm1026_vm11, %vm1024_vm10 }
 0x2a4   :  { %v2489_v15 = vpop.eup %2488  ;;  %v904_v44 = vadd.f32 1.0, %v2487_v40  ;;  %2506 = vpow2.f32 %v1983_v36  ;;  %v782_v45 = vadd.f32 %v781_v42, %v3178_v56  ;;  %v783_v1 = vpop.f32.mrb[30].mxu1  ;;  %vm2033_vm15 = vmpackc.low %vm1027_vm13, %vm1025_vm12  ;;  %v1004_v36 = vld [vmem:[#allocation13 + $0xc0] sm:$0xff]  ;;  %v1010_v42 = vld [vmem:[#allocation13 + $0xf0] sm:$0xff] }
 0x2a5   :  { %v2491_v2 = vpop.eup %2490  ;;  %v905_v46 = vadd.f32 1.0, %v2489_v15  ;;  %2508 = vpow2.f32 %v1984_v13  ;;  %v784_v47 = vadd.f32 %v783_v1, %v3176_v55  ;;  %2034 = vmatprep.mubr.msk.bf16.mxu0 %vm2033_vm15, %v2935_v33  ;;  %v785_v48 = vpop.f32.mrb[31].mxu1  ;;  %v1985_v3 = vmul.f32 -1.442695, %v780_v41  ;;  %v1007_v13 = vld [vmem:[#allocation13 + $0xd8] sm:$0xff]  ;;  %v1008_v41 = vld [vmem:[#allocation13 + $0xe0] sm:$0xff] }
 0x2a6   :  { %v2493_v49 = vpop.eup %2492  ;;  %2510 = vrcp.f32 %v904_v44  ;;  %v906_v50 = vadd.f32 1.0, %v2491_v2  ;;  %v786_v51 = vadd.f32 %v785_v48, %v3178_v56  ;;  %2036 = vmatmul.mubr.msk.bf16.gmra.mrb[44].mxu0 %vm3233_vm14, %v2935_v33  ;;  %v1986_v52 = vmul.f32 -1.442695, %v782_v45  ;;  %v1009_v15 = vld [vmem:[#allocation13 + $0xe8] sm:$0xff]  ;;  %v1011_v44 = vld [vmem:[#allocation13 + $0xf8] sm:$0xff] }
 0x2a7   :  { %2512 = vrcp.f32 %v905_v46  ;;  %v907_v4 = vadd.f32 1.0, %v2493_v49  ;;  %v1987_v54 = vmul.f32 -1.442695, %v784_v47 }
 0x2a8   :  { %v2495_v53 = vpop.eup %2494  ;;  %2514 = vrcp.f32 %v906_v50  ;;  %v1988_v5 = vmul.f32 -1.442695, %v786_v51  ;;  %v3252_v50 = vld [vmem:[#allocation8] ss:$0 sm:$0xff] }
 0x2a9   :  { %v2497_v59 = vpop.eup %2496  ;;  %2516 = vrcp.f32 %v907_v4  ;;  %vm1028_vm0 = vcmp.lt.f32.partialorder %v996_v57, %v2495_v53 }
 0x2aa   :  { %v2499_v61 = vpop.eup %2498  ;;  %2518 = vpow2.f32 %v1985_v3  ;;  %vm1029_vm2 = vcmp.lt.f32.partialorder %v997_v6, %v2497_v59 }
 0x2ab   :  { %v2501_v62 = vpop.eup %2500  ;;  %2520 = vpow2.f32 %v1986_v52  ;;  %vm1030_vm1 = vcmp.lt.f32.partialorder %v998_v58, %v2499_v61 }
 0x2ac   :  { %v2503_v63 = vpop.eup %2502  ;;  %2522 = vpow2.f32 %v1987_v54  ;;  %vm1031_vm3 = vcmp.lt.f32.partialorder %v999_v60, %v2501_v62  ;;  %vm2039_vm4 = vmpackc.low %vm1030_vm1, %vm1028_vm0 }
 0x2ad   :  { %v2505_v0 = vpop.eup %2504  ;;  %v908_v7 = vadd.f32 1.0, %v2503_v63  ;;  %2524 = vpow2.f32 %v1988_v5  ;;  %vm2037_vm5 = vmpackc.low %vm1031_vm3, %vm1029_vm2 }
 0x2ae   :  { %v2507_v17 = vpop.eup %2506  ;;  %v909_v8 = vadd.f32 1.0, %v2505_v0  ;;  %2038 = vmatprep.mubr.msk.bf16.mxu0 %vm2037_vm5, %v2935_v33 }
 0x2af   :  { %v2509_v19 = vpop.eup %2508  ;;  %2526 = vrcp.f32 %v908_v7  ;;  %v910_v20 = vadd.f32 1.0, %v2507_v17  ;;  %2040 = vmatmul.mubr.msk.bf16.gmra.mrb[48].mxu0 %vm2039_vm4, %v2935_v33 }
 0x2b0   :  { %v2511_v21 = vpop.eup %2510  ;;  %2528 = vrcp.f32 %v909_v8  ;;  %v911_v22 = vadd.f32 1.0, %v2509_v19 }
 0x2b1   :  { %v2513_v25 = vpop.eup %2512  ;;  %2530 = vrcp.f32 %v910_v20  ;;  %vm1032_vm6 = vcmp.lt.f32.partialorder %v1000_v23, %v2511_v21 }
 0x2b2   :  { %v2515_v10 = vpop.eup %2514  ;;  %2532 = vrcp.f32 %v911_v22  ;;  %vm1033_vm8 = vcmp.lt.f32.partialorder %v1001_v26, %v2513_v25 }
 0x2b3   :  { %v2517_v27 = vpop.eup %2516  ;;  %vm1034_vm7 = vcmp.lt.f32.partialorder %v1002_v24, %v2515_v10 }
 0x2b4   :  { %v2519_v28 = vpop.eup %2518  ;;  %vm1035_vm9 = vcmp.lt.f32.partialorder %v1003_v9, %v2517_v27  ;;  %vm2043_vm10 = vmpackc.low %vm1034_vm7, %vm1032_vm6 }
 0x2b5   :  { %v2521_v29 = vpop.eup %2520  ;;  %v912_v30 = vadd.f32 1.0, %v2519_v28  ;;  %vm2041_vm11 = vmpackc.low %vm1035_vm9, %vm1033_vm8 }
 0x2b6   :  { %v2523_v31 = vpop.eup %2522  ;;  %v913_v11 = vadd.f32 1.0, %v2521_v29  ;;  %2042 = vmatprep.mubr.msk.bf16.mxu0 %vm2041_vm11, %v2935_v33 }
 0x2b7   :  { %v2525_v32 = vpop.eup %2524  ;;  %2534 = vrcp.f32 %v912_v30  ;;  %v914_v12 = vadd.f32 1.0, %v2523_v31  ;;  %2044 = vmatmul.mubr.msk.bf16.gmra.mrb[52].mxu0 %vm2043_vm10, %v2935_v33 }
 0x2b8   :  { %2536 = vrcp.f32 %v913_v11  ;;  %v915_v34 = vadd.f32 1.0, %v2525_v32 }
 0x2b9   :  { %v2527_v35 = vpop.eup %2526  ;;  %2538 = vrcp.f32 %v914_v12 }
 0x2ba   :  { %v2529_v38 = vpop.eup %2528  ;;  %2540 = vrcp.f32 %v915_v34  ;;  %vm1036_vm12 = vcmp.lt.f32.partialorder %v1004_v36, %v2527_v35 }
 0x2bb   :  { %v2531_v14 = vpop.eup %2530  ;;  %vm1037_vm14 = vcmp.lt.f32.partialorder %v1005_v39, %v2529_v38 }
 0x2bc   :  { %v2533_v18 = vpop.eup %2532  ;;  %vm1038_vm13 = vcmp.lt.f32.partialorder %v1006_v37, %v2531_v14  ;;  %v1319_v14 = vld [vmem:[#allocation11 + $0x88] sm:$0xff] }
 0x2bd   :  { %vm1039_vm15 = vcmp.lt.f32.partialorder %v1007_v13, %v2533_v18  ;;  %vm2047_vm0 = vmpackc.low %vm1038_vm13, %vm1036_vm12  ;;  %v1318_v13 = vld [vmem:[#allocation11 + $0x80] sm:$0xff] }
 0x2be   :  { %vm2045_vm1 = vmpackc.low %vm1039_vm15, %vm1037_vm14 }
 0x2bf   :  { %2046 = vmatprep.mubr.msk.bf16.mxu0 %vm2045_vm1, %v2935_v33 }
 0x2c0   :  { %2048 = vmatmul.mubr.msk.bf16.gmra.mrb[56].mxu0 %vm2047_vm0, %v2935_v33 }
 0x2c1   :  { %v2535_v40 = vpop.eup %2534 }
 0x2c2   :  { %v2537_v43 = vpop.eup %2536  ;;  %vm1040_vm2 = vcmp.lt.f32.partialorder %v1008_v41, %v2535_v40 }
 0x2c3   :  { %v2539_v45 = vpop.eup %2538  ;;  %vm1041_vm4 = vcmp.lt.f32.partialorder %v1009_v15, %v2537_v43 }
 0x2c4   :  { %v2541_v1 = vpop.eup %2540  ;;  %vm1042_vm3 = vcmp.lt.f32.partialorder %v1010_v42, %v2539_v45 }
 0x2c5   :  { %vm1043_vm5 = vcmp.lt.f32.partialorder %v1011_v44, %v2541_v1  ;;  %vm2051_vm6 = vmpackc.low %vm1042_vm3, %vm1040_vm2 }
 0x2c6   :  { %vm2049_vm7 = vmpackc.low %vm1043_vm5, %vm1041_vm4 }
 0x2c7   :  { %2050 = vmatprep.mubr.msk.bf16.mxu0 %vm2049_vm7, %v2935_v33 }
 0x2c8   :  { %2052 = vmatmul.mubr.msk.bf16.gmra.mrb[60].mxu0 %vm2051_vm6, %v2935_v33 }
 0x360   :  { %v2245_v2 = vpop.f32.mrb[32].mxu0 }
 0x361   :  { %v2246_v46 = vpop.f32.mrb[33].mxu0 }
 0x362   :  { %v2247_v47 = vadd.f32 %v2246_v46, %v2245_v2  ;;  %v2248_v48 = vpop.f32.mrb[34].mxu0 }
 0x363   :  { %v2249_v49 = vpop.f32.mrb[35].mxu0 }
 0x364   :  { %v1159_v3 = vadd.f32 %v3252_v50, %v2247_v47  ;;  %v2250_v51 = vadd.f32 %v2249_v49, %v2248_v48 }
 0x366   :  { %v2053_v4 = vmul.f32 -1.442695, %v1159_v3  ;;  %v1162_v52 = vadd.f32 %v3252_v50, %v2250_v51  ;;  %v1320_v3 = vld [vmem:[#allocation11 + $0x90] sm:$0xff]  ;;  %v1321_v51 = vld [vmem:[#allocation11 + $0x98] sm:$0xff] }
 0x368   :  { %2542 = vpow2.f32 %v2053_v4  ;;  %v2054_v53 = vmul.f32 -1.442695, %v1162_v52  ;;  %v2251_v54 = vpop.f32.mrb[36].mxu0 }
 0x369   :  { %v2252_v57 = vpop.f32.mrb[37].mxu0 }
 0x36a   :  { %2544 = vpow2.f32 %v2054_v53  ;;  %v2253_v58 = vadd.f32 %v2252_v57, %v2251_v54  ;;  %v2254_v59 = vpop.f32.mrb[38].mxu0 }
 0x36b   :  { %v2255_v5 = vpop.f32.mrb[39].mxu0 }
 0x36c   :  { %v1167_v6 = vadd.f32 %v3252_v50, %v2253_v58  ;;  %v2256_v60 = vadd.f32 %v2255_v5, %v2254_v59 }
 0x36e   :  { %v2055_v61 = vmul.f32 -1.442695, %v1167_v6  ;;  %v1170_v62 = vadd.f32 %v3252_v50, %v2256_v60 }
 0x370   :  { %2546 = vpow2.f32 %v2055_v61  ;;  %v2056_v63 = vmul.f32 -1.442695, %v1170_v62 }
 0x371   :  { %v2257_v0 = vpop.f32.mrb[40].mxu0 }
 0x372   :  { %v2543_v7 = vpop.eup %2542  ;;  %2548 = vpow2.f32 %v2056_v63  ;;  %v2258_v17 = vpop.f32.mrb[41].mxu0 }
 0x373   :  { %v1269_v8 = vadd.f32 1.0, %v2543_v7  ;;  %v2259_v19 = vadd.f32 %v2258_v17, %v2257_v0  ;;  %v2260_v20 = vpop.f32.mrb[42].mxu0 }
 0x374   :  { %v2545_v21 = vpop.eup %2544  ;;  %v2261_v22 = vpop.f32.mrb[43].mxu0 }
 0x375   :  { %2550 = vrcp.f32 %v1269_v8  ;;  %v1270_v23 = vadd.f32 1.0, %v2545_v21  ;;  %v1175_v24 = vadd.f32 %v3252_v50, %v2259_v19  ;;  %v2262_v25 = vadd.f32 %v2261_v22, %v2260_v20  ;;  %v1322_v20 = vld [vmem:[#allocation11 + $0xa0] sm:$0xff]  ;;  %v1323_v21 = vld [vmem:[#allocation11 + $0xa8] sm:$0xff] }
 0x377   :  { %2552 = vrcp.f32 %v1270_v23  ;;  %v2057_v26 = vmul.f32 -1.442695, %v1175_v24  ;;  %v1178_v9 = vadd.f32 %v3252_v50, %v2262_v25 }
 0x379   :  { %2554 = vpow2.f32 %v2057_v26  ;;  %v2058_v10 = vmul.f32 -1.442695, %v1178_v9  ;;  %v2263_v27 = vpop.f32.mrb[44].mxu0 }
 0x37a   :  { %v2547_v28 = vpop.eup %2546  ;;  %v2264_v29 = vpop.f32.mrb[45].mxu0 }
 0x37b   :  { %v1271_v30 = vadd.f32 1.0, %v2547_v28  ;;  %2556 = vpow2.f32 %v2058_v10  ;;  %v2265_v31 = vadd.f32 %v2264_v29, %v2263_v27  ;;  %v2266_v11 = vpop.f32.mrb[46].mxu0 }
 0x37c   :  { %v2549_v32 = vpop.eup %2548  ;;  %v2267_v12 = vpop.f32.mrb[47].mxu0 }
 0x37d   :  { %2558 = vrcp.f32 %v1271_v30  ;;  %v1272_v34 = vadd.f32 1.0, %v2549_v32  ;;  %v1183_v35 = vadd.f32 %v3252_v50, %v2265_v31  ;;  %v2268_v36 = vadd.f32 %v2267_v12, %v2266_v11  ;;  %v1324_v12 = vld [vmem:[#allocation11 + $0xb0] sm:$0xff] }
 0x37f   :  { %v2551_v37 = vpop.eup %2550  ;;  %2560 = vrcp.f32 %v1272_v34  ;;  %v2059_v38 = vmul.f32 -1.442695, %v1183_v35  ;;  %v1186_v39 = vadd.f32 %v3252_v50, %v2268_v36  ;;  %v1325_v34 = vld [vmem:[#allocation11 + $0xb8] sm:$0xff] }
 0x380   :  { %vm1334_vm8 = vcmp.lt.f32.partialorder %v1318_v13, %v2551_v37 }
 0x381   :  { %v2553_v18 = vpop.eup %2552  ;;  %2562 = vpow2.f32 %v2059_v38  ;;  %v2060_v40 = vmul.f32 -1.442695, %v1186_v39 }
 0x382   :  { %v2269_v41 = vpop.f32.mrb[48].mxu0  ;;  %vm1335_vm9 = vcmp.lt.f32.partialorder %v1319_v14, %v2553_v18 }
 0x383   :  { %v2555_v42 = vpop.eup %2554  ;;  %2564 = vpow2.f32 %v2060_v40  ;;  %v2270_v43 = vpop.f32.mrb[49].mxu0  ;;  %vm2085_vm10 = vmpackc.low %vm1335_vm9, %vm1334_vm8 }
 0x384   :  { %v1273_v15 = vadd.f32 1.0, %v2555_v42  ;;  %v2271_v44 = vadd.f32 %v2270_v43, %v2269_v41  ;;  %v2272_v45 = vpop.f32.mrb[50].mxu0  ;;  %2086 = vmatmul.mubr.msk.bf16.vlgmr.msra.gmra.mrb[32].mxu1 %vm2085_vm10, %v2935_v33 }
 0x385   :  { %v2557_v1 = vpop.eup %2556  ;;  %v2273_v2 = vpop.f32.mrb[51].mxu0  ;;  %1432 = vmatprep.mubr.bf16.mxu1 %v2934_v16 }
 0x386   :  { %2566 = vrcp.f32 %v1273_v15  ;;  %v1274_v46 = vadd.f32 1.0, %v2557_v1  ;;  %v1191_v47 = vadd.f32 %v3252_v50, %v2271_v44  ;;  %v2274_v48 = vadd.f32 %v2273_v2, %v2272_v45 }
 0x387   :  { %v2559_v49 = vpop.eup %2558 }
 0x388   :  { %2568 = vrcp.f32 %v1274_v46  ;;  %v2061_v4 = vmul.f32 -1.442695, %v1191_v47  ;;  %v1194_v52 = vadd.f32 %v3252_v50, %v2274_v48  ;;  %vm1336_vm11 = vcmp.lt.f32.partialorder %v1320_v3, %v2559_v49  ;;  %v1326_v47 = vld [vmem:[#allocation11 + $0xc0] sm:$0xff]  ;;  %v1327_v48 = vld [vmem:[#allocation11 + $0xc8] sm:$0xff] }
 0x389   :  { %v2561_v53 = vpop.eup %2560 }
 0x38a   :  { %2570 = vpow2.f32 %v2061_v4  ;;  %v2062_v54 = vmul.f32 -1.442695, %v1194_v52  ;;  %v2275_v57 = vpop.f32.mrb[52].mxu0  ;;  %vm1337_vm12 = vcmp.lt.f32.partialorder %v1321_v51, %v2561_v53 }
 0x38b   :  { %v2563_v58 = vpop.eup %2562  ;;  %v2276_v59 = vpop.f32.mrb[53].mxu0  ;;  %vm2087_vm13 = vmpackc.low %vm1337_vm12, %vm1336_vm11 }
 0x38c   :  { %v1275_v5 = vadd.f32 1.0, %v2563_v58  ;;  %2572 = vpow2.f32 %v2062_v54  ;;  %v2277_v6 = vadd.f32 %v2276_v59, %v2275_v57  ;;  %v2278_v60 = vpop.f32.mrb[54].mxu0  ;;  %2088 = vmatmul.mubr.msk.bf16.gmra.mrb[36].mxu1 %vm2087_vm13, %v2935_v33  ;;  %v1329_v57 = vld [vmem:[#allocation11 + $0xd8] sm:$0xff] }
 0x38d   :  { %v2565_v61 = vpop.eup %2564  ;;  %v2279_v62 = vpop.f32.mrb[55].mxu0  ;;  %1442 = vmatprep.mubr.bf16.mxu1 %v2934_v16 }
 0x38e   :  { %2574 = vrcp.f32 %v1275_v5  ;;  %v1276_v63 = vadd.f32 1.0, %v2565_v61  ;;  %v1199_v0 = vadd.f32 %v3252_v50, %v2277_v6  ;;  %v2280_v7 = vadd.f32 %v2279_v62, %v2278_v60  ;;  %v1330_v62 = vld [vmem:[#allocation11 + $0xe0] sm:$0xff] }
 0x390   :  { %v2567_v17 = vpop.eup %2566  ;;  %2576 = vrcp.f32 %v1276_v63  ;;  %v2063_v8 = vmul.f32 -1.442695, %v1199_v0  ;;  %v1202_v19 = vadd.f32 %v3252_v50, %v2280_v7  ;;  %v1331_v63 = vld [vmem:[#allocation11 + $0xe8] sm:$0xff] }
 0x391   :  { %vm1338_vm14 = vcmp.lt.f32.partialorder %v1322_v20, %v2567_v17  ;;  %v1332_v17 = vld [vmem:[#allocation11 + $0xf0] sm:$0xff] }
 0x392   :  { %v2569_v22 = vpop.eup %2568  ;;  %2578 = vpow2.f32 %v2063_v8  ;;  %v2064_v23 = vmul.f32 -1.442695, %v1202_v19  ;;  %v1333_v8 = vld [vmem:[#allocation11 + $0xf8] sm:$0xff] }
 0x393   :  { %v2281_v24 = vpop.f32.mrb[56].mxu0  ;;  %vm1339_vm15 = vcmp.lt.f32.partialorder %v1323_v21, %v2569_v22 }
 0x394   :  { %v2571_v25 = vpop.eup %2570  ;;  %2580 = vpow2.f32 %v2064_v23  ;;  %v2282_v26 = vpop.f32.mrb[57].mxu0  ;;  %vm2089_vm0 = vmpackc.low %vm1339_vm15, %vm1338_vm14 }
 0x395   :  { %v1277_v9 = vadd.f32 1.0, %v2571_v25  ;;  %v2283_v10 = vadd.f32 %v2282_v26, %v2281_v24  ;;  %v2284_v27 = vpop.f32.mrb[58].mxu0  ;;  %2090 = vmatmul.mubr.msk.bf16.gmra.mrb[40].mxu1 %vm2089_vm0, %v2935_v33 }
 0x396   :  { %v2573_v28 = vpop.eup %2572  ;;  %v2285_v29 = vpop.f32.mrb[59].mxu0  ;;  %1452 = vmatprep.mubr.bf16.mxu1 %v2934_v16 }
 0x397   :  { %2582 = vrcp.f32 %v1277_v9  ;;  %v1278_v30 = vadd.f32 1.0, %v2573_v28  ;;  %v1207_v31 = vadd.f32 %v3252_v50, %v2283_v10  ;;  %v2286_v11 = vadd.f32 %v2285_v29, %v2284_v27 }
 0x398   :  { %v2575_v32 = vpop.eup %2574 }
 0x399   :  { %2584 = vrcp.f32 %v1278_v30  ;;  %v2065_v35 = vmul.f32 -1.442695, %v1207_v31  ;;  %v1210_v36 = vadd.f32 %v3252_v50, %v2286_v11  ;;  %vm1340_vm1 = vcmp.lt.f32.partialorder %v1324_v12, %v2575_v32 }
 0x39a   :  { %v2577_v37 = vpop.eup %2576 }
 0x39b   :  { %2586 = vpow2.f32 %v2065_v35  ;;  %v2066_v38 = vmul.f32 -1.442695, %v1210_v36  ;;  %v2287_v39 = vpop.f32.mrb[60].mxu0  ;;  %vm1341_vm2 = vcmp.lt.f32.partialorder %v1325_v34, %v2577_v37 }
 0x39c   :  { %v2579_v13 = vpop.eup %2578  ;;  %v2288_v14 = vpop.f32.mrb[61].mxu0  ;;  %vm2091_vm3 = vmpackc.low %vm1341_vm2, %vm1340_vm1 }
 0x39d   :  { %v1279_v18 = vadd.f32 1.0, %v2579_v13  ;;  %2588 = vpow2.f32 %v2066_v38  ;;  %v2289_v40 = vadd.f32 %v2288_v14, %v2287_v39  ;;  %v2290_v41 = vpop.f32.mrb[62].mxu0  ;;  %2092 = vmatmul.mubr.msk.bf16.gmra.mrb[44].mxu1 %vm2091_vm3, %v2935_v33 }
 0x39e   :  { %v2581_v42 = vpop.eup %2580  ;;  %v2291_v43 = vpop.f32.mrb[63].mxu0  ;;  %1462 = vmatprep.mubr.bf16.mxu1 %v2934_v16 }
 0x39f   :  { %2590 = vrcp.f32 %v1279_v18  ;;  %v1280_v15 = vadd.f32 1.0, %v2581_v42  ;;  %v1215_v44 = vadd.f32 %v3252_v50, %v2289_v40  ;;  %v2292_v45 = vadd.f32 %v2291_v43, %v2290_v41 }
 0x3a1   :  { %v2583_v1 = vpop.eup %2582  ;;  %2592 = vrcp.f32 %v1280_v15  ;;  %v2067_v2 = vmul.f32 -1.442695, %v1215_v44  ;;  %v1218_v46 = vadd.f32 %v3252_v50, %v2292_v45  ;;  %v1328_v50 = vld [vmem:[#allocation11 + $0xd0] sm:$0xff] }
 0x3a2   :  { %vm1342_vm4 = vcmp.lt.f32.partialorder %v1326_v47, %v2583_v1 }
 0x3a3   :  { %v2585_v49 = vpop.eup %2584  ;;  %2594 = vpow2.f32 %v2067_v2  ;;  %v2068_v3 = vmul.f32 -1.442695, %v1218_v46 }
 0x3a4   :  { %vm1343_vm5 = vcmp.lt.f32.partialorder %v1327_v48, %v2585_v49 }
 0x3a5   :  { %v2587_v51 = vpop.eup %2586  ;;  %2596 = vpow2.f32 %v2068_v3  ;;  %vm2093_vm6 = vmpackc.low %vm1343_vm5, %vm1342_vm4 }
 0x3a6   :  { %v1281_v4 = vadd.f32 1.0, %v2587_v51  ;;  %2094 = vmatmul.mubr.msk.bf16.gmra.mrb[48].mxu1 %vm2093_vm6, %v2935_v33 }
 0x3a7   :  { %v2589_v52 = vpop.eup %2588  ;;  %1472 = vmatprep.mubr.bf16.mxu1 %v2934_v16 }
 0x3a8   :  { %2598 = vrcp.f32 %v1281_v4  ;;  %v1282_v53 = vadd.f32 1.0, %v2589_v52 }
 0x3a9   :  { %v2591_v54 = vpop.eup %2590 }
 0x3aa   :  { %2600 = vrcp.f32 %v1282_v53  ;;  %vm1344_vm7 = vcmp.lt.f32.partialorder %v1328_v50, %v2591_v54 }
 0x3ab   :  { %v2593_v58 = vpop.eup %2592 }
 0x3ac   :  { %vm1345_vm8 = vcmp.lt.f32.partialorder %v1329_v57, %v2593_v58 }
 0x3ad   :  { %v2595_v59 = vpop.eup %2594  ;;  %vm2095_vm9 = vmpackc.low %vm1345_vm8, %vm1344_vm7 }
 0x3ae   :  { %v1283_v5 = vadd.f32 1.0, %v2595_v59  ;;  %2096 = vmatmul.mubr.msk.bf16.gmra.mrb[52].mxu1 %vm2095_vm9, %v2935_v33 }
 0x3af   :  { %v2597_v6 = vpop.eup %2596  ;;  %1482 = vmatprep.mubr.bf16.mxu1 %v2934_v16 }
 0x3b0   :  { %2602 = vrcp.f32 %v1283_v5  ;;  %v1284_v60 = vadd.f32 1.0, %v2597_v6  ;;  %v1696_v5 = vld [vmem:[#allocation13 + $0x100] sm:$0xff] }
 0x3b2   :  { %v2599_v61 = vpop.eup %2598  ;;  %2604 = vrcp.f32 %v1284_v60 }
 0x3b3   :  { %vm1346_vm10 = vcmp.lt.f32.partialorder %v1330_v62, %v2599_v61  ;;  %v1697_v62 = vld [vmem:[#allocation13 + $0x108] sm:$0xff] }
 0x3b4   :  { %v2601_v0 = vpop.eup %2600 }
 0x3b5   :  { %vm1347_vm11 = vcmp.lt.f32.partialorder %v1331_v63, %v2601_v0 }
 0x3b6   :  { %vm2097_vm12 = vmpackc.low %vm1347_vm11, %vm1346_vm10 }
 0x3b7   :  { %2098 = vmatmul.mubr.msk.bf16.gmra.mrb[56].mxu1 %vm2097_vm12, %v2935_v33 }
 0x3b8   :  { %1492 = vmatprep.mubr.bf16.mxu1 %v2934_v16 }
 0x3ba   :  { %v2603_v7 = vpop.eup %2602 }
 0x3bb   :  { %vm1348_vm13 = vcmp.lt.f32.partialorder %v1332_v17, %v2603_v7 }
 0x3bc   :  { %v2605_v19 = vpop.eup %2604 }
 0x3bd   :  { %vm1349_vm14 = vcmp.lt.f32.partialorder %v1333_v8, %v2605_v19  ;;  %v1698_v8 = vld [vmem:[#allocation13 + $0x110] sm:$0xff] }
 0x3be   :  { %vm2099_vm15 = vmpackc.low %vm1349_vm14, %vm1348_vm13 }
 0x3bf   :  { %2100 = vmatmul.mubr.msk.bf16.gmra.mrb[60].mxu1 %vm2099_vm15, %v2935_v33 }
 0x457   :  { %v1424_v20 = vpop.f32.mrb[32].mxu1 }
 0x458   :  { %v1425_v21 = vadd.f32 %v1424_v20, %v3176_v55  ;;  %v1426_v22 = vpop.f32.mrb[33].mxu1 }
 0x459   :  { %v1427_v23 = vadd.f32 %v1426_v22, %v3178_v56  ;;  %v1428_v24 = vpop.f32.mrb[34].mxu1 }
 0x45a   :  { %v2101_v25 = vmul.f32 -1.442695, %v1425_v21  ;;  %v1429_v26 = vadd.f32 %v1428_v24, %v3176_v55  ;;  %v1430_v16 = vpop.f32.mrb[35].mxu1 }
 0x45b   :  { %v2102_v9 = vmul.f32 -1.442695, %v1427_v23  ;;  %v1431_v10 = vadd.f32 %v1430_v16, %v3178_v56  ;;  %v1699_v23 = vld [vmem:[#allocation13 + $0x118] sm:$0xff]  ;;  %v2936_v16 = vmov 0.0  }
 0x45c   :  { %2606 = vpow2.f32 %v2101_v25  ;;  %v2103_v27 = vmul.f32 -1.442695, %v1429_v26 }
 0x45d   :  { %2608 = vpow2.f32 %v2102_v9  ;;  %v2104_v28 = vmul.f32 -1.442695, %v1431_v10 }
 0x45e   :  { %2610 = vpow2.f32 %v2103_v27 }
 0x45f   :  { %2612 = vpow2.f32 %v2104_v28  ;;  %v1434_v33 = vpop.f32.mrb[36].mxu1 }
 0x460   :  { %v1435_v29 = vadd.f32 %v1434_v33, %v3176_v55  ;;  %v1436_v30 = vpop.f32.mrb[37].mxu1 }
 0x461   :  { %v1437_v31 = vadd.f32 %v1436_v30, %v3178_v56  ;;  %v1438_v11 = vpop.f32.mrb[38].mxu1 }
 0x462   :  { %v2105_v32 = vmul.f32 -1.442695, %v1435_v29  ;;  %v1439_v12 = vadd.f32 %v1438_v11, %v3176_v55  ;;  %v1440_v34 = vpop.f32.mrb[39].mxu1 }
 0x463   :  { %v2106_v35 = vmul.f32 -1.442695, %v1437_v31  ;;  %v1441_v36 = vadd.f32 %v1440_v34, %v3178_v56  ;;  %v1700_v34 = vld [vmem:[#allocation13 + $0x120] sm:$0xff] }
 0x464   :  { %2614 = vpow2.f32 %v2105_v32  ;;  %v2107_v37 = vmul.f32 -1.442695, %v1439_v12 }
 0x465   :  { %2616 = vpow2.f32 %v2106_v35  ;;  %v2108_v38 = vmul.f32 -1.442695, %v1441_v36 }
 0x466   :  { %v2607_v39 = vpop.eup %2606  ;;  %2618 = vpow2.f32 %v2107_v37 }
 0x467   :  { %v2609_v13 = vpop.eup %2608  ;;  %v1599_v14 = vadd.f32 1.0, %v2607_v39  ;;  %2620 = vpow2.f32 %v2108_v38  ;;  %v1701_v38 = vld [vmem:[#allocation13 + $0x128] sm:$0xff] }
 0x468   :  { %v2611_v18 = vpop.eup %2610  ;;  %v1600_v40 = vadd.f32 1.0, %v2609_v13  ;;  %v1444_v41 = vpop.f32.mrb[40].mxu1 }
 0x469   :  { %v2613_v42 = vpop.eup %2612  ;;  %2622 = vrcp.f32 %v1599_v14  ;;  %v1601_v43 = vadd.f32 1.0, %v2611_v18  ;;  %v1445_v15 = vadd.f32 %v1444_v41, %v3176_v55  ;;  %v1446_v44 = vpop.f32.mrb[41].mxu1 }
 0x46a   :  { %2624 = vrcp.f32 %v1600_v40  ;;  %v1602_v45 = vadd.f32 1.0, %v2613_v42  ;;  %v1447_v1 = vadd.f32 %v1446_v44, %v3178_v56  ;;  %v1448_v2 = vpop.f32.mrb[42].mxu1  ;;  %v1702_v40 = vld [vmem:[#allocation13 + $0x130] sm:$0xff]  ;;  %v1703_v44 = vld [vmem:[#allocation13 + $0x138] sm:$0xff] }
 0x46b   :  { %2626 = vrcp.f32 %v1601_v43  ;;  %v2109_v46 = vmul.f32 -1.442695, %v1445_v15  ;;  %v1449_v47 = vadd.f32 %v1448_v2, %v3176_v55  ;;  %v1450_v48 = vpop.f32.mrb[43].mxu1 }
 0x46c   :  { %2628 = vrcp.f32 %v1602_v45  ;;  %v2110_v49 = vmul.f32 -1.442695, %v1447_v1  ;;  %v1451_v3 = vadd.f32 %v1450_v48, %v3178_v56 }
 0x46d   :  { %2630 = vpow2.f32 %v2109_v46  ;;  %v2111_v51 = vmul.f32 -1.442695, %v1449_v47 }
 0x46e   :  { %v2615_v4 = vpop.eup %2614  ;;  %2632 = vpow2.f32 %v2110_v49  ;;  %v2112_v52 = vmul.f32 -1.442695, %v1451_v3 }
 0x46f   :  { %v2617_v53 = vpop.eup %2616  ;;  %v1603_v54 = vadd.f32 1.0, %v2615_v4  ;;  %2634 = vpow2.f32 %v2111_v51 }
 0x470   :  { %v2619_v50 = vpop.eup %2618  ;;  %v1604_v57 = vadd.f32 1.0, %v2617_v53  ;;  %2636 = vpow2.f32 %v2112_v52  ;;  %v1454_v58 = vpop.f32.mrb[44].mxu1 }
 0x471   :  { %v2621_v59 = vpop.eup %2620  ;;  %2638 = vrcp.f32 %v1603_v54  ;;  %v1605_v6 = vadd.f32 1.0, %v2619_v50  ;;  %v1455_v60 = vadd.f32 %v1454_v58, %v3176_v55  ;;  %v1456_v61 = vpop.f32.mrb[45].mxu1 }
 0x472   :  { %2640 = vrcp.f32 %v1604_v57  ;;  %v1606_v63 = vadd.f32 1.0, %v2621_v59  ;;  %v1457_v0 = vadd.f32 %v1456_v61, %v3178_v56  ;;  %v1458_v7 = vpop.f32.mrb[46].mxu1 }
 0x473   :  { %v2623_v17 = vpop.eup %2622  ;;  %2642 = vrcp.f32 %v1605_v6  ;;  %v2113_v19 = vmul.f32 -1.442695, %v1455_v60  ;;  %v1459_v20 = vadd.f32 %v1458_v7, %v3176_v55  ;;  %v1460_v21 = vpop.f32.mrb[47].mxu1  ;;  %v1704_v60 = vld [vmem:[#allocation13 + $0x140] sm:$0xff]  ;;  %v1705_v7 = vld [vmem:[#allocation13 + $0x148] sm:$0xff] }
 0x474   :  { %v2625_v22 = vpop.eup %2624  ;;  %vm1728_vm0 = vcmp.lt.f32.partialorder %v1696_v5, %v2623_v17  ;;  %2644 = vrcp.f32 %v1606_v63  ;;  %v2114_v24 = vmul.f32 -1.442695, %v1457_v0  ;;  %v1461_v25 = vadd.f32 %v1460_v21, %v3178_v56  ;;  %v1706_v21 = vld [vmem:[#allocation13 + $0x150] sm:$0xff] }
 0x475   :  { %v2627_v26 = vpop.eup %2626  ;;  %v2133_v9 = vsel %vm1728_vm0, 1.0, %v2936_v16  ;;  %vm1729_vm1 = vcmp.lt.f32.partialorder %v1697_v62, %v2625_v22  ;;  %2646 = vpow2.f32 %v2113_v19  ;;  %v2115_v10 = vmul.f32 -1.442695, %v1459_v20 }
 0x476   :  { %v2629_v27 = vpop.eup %2628  ;;  %1824 = vst [vmem:[#allocation14] sm:$0xff] %v2133_v9  ;;  %v2134_v28 = vsel %vm1729_vm1, 1.0, %v2936_v16  ;;  %vm1730_vm2 = vcmp.lt.f32.partialorder %v1698_v8, %v2627_v26  ;;  %2648 = vpow2.f32 %v2114_v24  ;;  %v2116_v33 = vmul.f32 -1.442695, %v1461_v25  ;;  %v1707_v26 = vld [vmem:[#allocation13 + $0x158] sm:$0xff] }
 0x477   :  { %v2631_v29 = vpop.eup %2630  ;;  %1825 = vst [vmem:[#allocation14 + $0x8] sm:$0xff] %v2134_v28  ;;  %v2135_v30 = vsel %vm1730_vm2, 1.0, %v2936_v16  ;;  %vm1731_vm3 = vcmp.lt.f32.partialorder %v1699_v23, %v2629_v27  ;;  %2650 = vpow2.f32 %v2115_v10 }
 0x478   :  { %v2633_v31 = vpop.eup %2632  ;;  %1826 = vst [vmem:[#allocation14 + $0x10] sm:$0xff] %v2135_v30  ;;  %v2136_v11 = vsel %vm1731_vm3, 1.0, %v2936_v16  ;;  %v1607_v32 = vadd.f32 1.0, %v2631_v29  ;;  %2652 = vpow2.f32 %v2116_v33 }
 0x479   :  { %v2635_v12 = vpop.eup %2634  ;;  %1827 = vst [vmem:[#allocation14 + $0x18] sm:$0xff] %v2136_v11  ;;  %v1608_v35 = vadd.f32 1.0, %v2633_v31  ;;  %v1464_v36 = vpop.f32.mrb[48].mxu1 }
 0x47a   :  { %v2637_v37 = vpop.eup %2636  ;;  %2654 = vrcp.f32 %v1607_v32  ;;  %v1609_v39 = vadd.f32 1.0, %v2635_v12  ;;  %v1465_v13 = vadd.f32 %v1464_v36, %v3176_v55  ;;  %v1466_v14 = vpop.f32.mrb[49].mxu1 }
 0x47b   :  { %v2639_v18 = vpop.eup %2638  ;;  %2656 = vrcp.f32 %v1608_v35  ;;  %v1610_v41 = vadd.f32 1.0, %v2637_v37  ;;  %v1467_v42 = vadd.f32 %v1466_v14, %v3178_v56  ;;  %v1468_v43 = vpop.f32.mrb[50].mxu1  ;;  %v1708_v37 = vld [vmem:[#allocation13 + $0x160] sm:$0xff] }
 0x47c   :  { %v2641_v15 = vpop.eup %2640  ;;  %vm1732_vm4 = vcmp.lt.f32.partialorder %v1700_v34, %v2639_v18  ;;  %2658 = vrcp.f32 %v1609_v39  ;;  %v2117_v45 = vmul.f32 -1.442695, %v1465_v13  ;;  %v1469_v1 = vadd.f32 %v1468_v43, %v3176_v55  ;;  %v1470_v2 = vpop.f32.mrb[51].mxu1  ;;  %v1709_v13 = vld [vmem:[#allocation13 + $0x168] sm:$0xff] }
 0x47d   :  { %v2643_v46 = vpop.eup %2642  ;;  %v2137_v47 = vsel %vm1732_vm4, 1.0, %v2936_v16  ;;  %vm1733_vm5 = vcmp.lt.f32.partialorder %v1701_v38, %v2641_v15  ;;  %2660 = vrcp.f32 %v1610_v41  ;;  %v2118_v48 = vmul.f32 -1.442695, %v1467_v42  ;;  %v1710_v42 = vld [vmem:[#allocation13 + $0x170] sm:$0xff] }
 0x47e   :  { %v2645_v49 = vpop.eup %2644  ;;  %1828 = vst [vmem:[#allocation14 + $0x20] sm:$0xff] %v2137_v47  ;;  %v2138_v3 = vsel %vm1733_vm5, 1.0, %v2936_v16  ;;  %vm1734_vm6 = vcmp.lt.f32.partialorder %v1702_v40, %v2643_v46  ;;  %2662 = vpow2.f32 %v2117_v45  ;;  %v2119_v51 = vmul.f32 -1.442695, %v1469_v1  ;;  %v1711_v45 = vld [vmem:[#allocation13 + $0x178] sm:$0xff] }
 0x47f   :  { %v2647_v4 = vpop.eup %2646  ;;  %1829 = vst [vmem:[#allocation14 + $0x28] sm:$0xff] %v2138_v3  ;;  %v2139_v52 = vsel %vm1734_vm6, 1.0, %v2936_v16  ;;  %vm1735_vm7 = vcmp.lt.f32.partialorder %v1703_v44, %v2645_v49  ;;  %2664 = vpow2.f32 %v2118_v48  ;;  %v1471_v53 = vadd.f32 %v1470_v2, %v3178_v56 }
 0x480   :  { %v2649_v54 = vpop.eup %2648  ;;  %1830 = vst [vmem:[#allocation14 + $0x30] sm:$0xff] %v2139_v52  ;;  %v2140_v50 = vsel %vm1735_vm7, 1.0, %v2936_v16  ;;  %v1611_v57 = vadd.f32 1.0, %v2647_v4  ;;  %2666 = vpow2.f32 %v2119_v51 }
 0x481   :  { %v2651_v58 = vpop.eup %2650  ;;  %1831 = vst [vmem:[#allocation14 + $0x38] sm:$0xff] %v2140_v50  ;;  %v1612_v59 = vadd.f32 1.0, %v2649_v54  ;;  %v1474_v5 = vpop.f32.mrb[52].mxu1  ;;  %v2120_v62 = vmul.f32 -1.442695, %v1471_v53 }
 0x482   :  { %v2653_v6 = vpop.eup %2652  ;;  %2668 = vrcp.f32 %v1611_v57  ;;  %v1613_v61 = vadd.f32 1.0, %v2651_v58  ;;  %v1475_v63 = vadd.f32 %v1474_v5, %v3176_v55  ;;  %v1476_v0 = vpop.f32.mrb[53].mxu1 }
 0x483   :  { %2670 = vrcp.f32 %v1612_v59  ;;  %v1614_v17 = vadd.f32 1.0, %v2653_v6  ;;  %v1477_v8 = vadd.f32 %v1476_v0, %v3178_v56  ;;  %v1478_v19 = vpop.f32.mrb[54].mxu1 }
 0x484   :  { %v2655_v20 = vpop.eup %2654  ;;  %2672 = vrcp.f32 %v1613_v61  ;;  %v2121_v22 = vmul.f32 -1.442695, %v1475_v63  ;;  %v1479_v23 = vadd.f32 %v1478_v19, %v3176_v55  ;;  %v1480_v24 = vpop.f32.mrb[55].mxu1 }
 0x485   :  { %v2657_v25 = vpop.eup %2656  ;;  %vm1736_vm8 = vcmp.lt.f32.partialorder %v1704_v60, %v2655_v20  ;;  %2674 = vrcp.f32 %v1614_v17  ;;  %v2122_v9 = vmul.f32 -1.442695, %v1477_v8  ;;  %v1481_v10 = vadd.f32 %v1480_v24, %v3178_v56  ;;  %v1713_v8 = vld [vmem:[#allocation13 + $0x188] sm:$0xff] }
 0x486   :  { %v2659_v27 = vpop.eup %2658  ;;  %v2141_v28 = vsel %vm1736_vm8, 1.0, %v2936_v16  ;;  %vm1737_vm9 = vcmp.lt.f32.partialorder %v1705_v7, %v2657_v25  ;;  %2676 = vpow2.f32 %v2120_v62  ;;  %v2123_v33 = vmul.f32 -1.442695, %v1479_v23  ;;  %v1712_v62 = vld [vmem:[#allocation13 + $0x180] sm:$0xff]  ;;  %v1714_v23 = vld [vmem:[#allocation13 + $0x190] sm:$0xff] }
 0x487   :  { %v2661_v29 = vpop.eup %2660  ;;  %1832 = vst [vmem:[#allocation14 + $0x40] sm:$0xff] %v2141_v28  ;;  %v2142_v30 = vsel %vm1737_vm9, 1.0, %v2936_v16  ;;  %vm1738_vm10 = vcmp.lt.f32.partialorder %v1706_v21, %v2659_v27  ;;  %2678 = vpow2.f32 %v2121_v22  ;;  %v2124_v31 = vmul.f32 -1.442695, %v1481_v10 }
 0x488   :  { %v2663_v11 = vpop.eup %2662  ;;  %1833 = vst [vmem:[#allocation14 + $0x48] sm:$0xff] %v2142_v30  ;;  %v2143_v32 = vsel %vm1738_vm10, 1.0, %v2936_v16  ;;  %vm1739_vm11 = vcmp.lt.f32.partialorder %v1707_v26, %v2661_v29  ;;  %2680 = vpow2.f32 %v2122_v9 }
 0x489   :  { %v2665_v12 = vpop.eup %2664  ;;  %1834 = vst [vmem:[#allocation14 + $0x50] sm:$0xff] %v2143_v32  ;;  %v2144_v34 = vsel %vm1739_vm11, 1.0, %v2936_v16  ;;  %v1615_v35 = vadd.f32 1.0, %v2663_v11  ;;  %2682 = vpow2.f32 %v2123_v33 }
 0x48a   :  { %v2667_v36 = vpop.eup %2666  ;;  %1835 = vst [vmem:[#allocation14 + $0x58] sm:$0xff] %v2144_v34  ;;  %v1616_v38 = vadd.f32 1.0, %v2665_v12  ;;  %2684 = vpow2.f32 %v2124_v31  ;;  %v1484_v39 = vpop.f32.mrb[56].mxu1 }
 0x48b   :  { %2686 = vrcp.f32 %v1615_v35  ;;  %v1617_v14 = vadd.f32 1.0, %v2667_v36  ;;  %v1485_v18 = vadd.f32 %v1484_v39, %v3176_v55  ;;  %v1486_v40 = vpop.f32.mrb[57].mxu1  ;;  %v1715_v35 = vld [vmem:[#allocation13 + $0x198] sm:$0xff] }
 0x48c   :  { %v2669_v41 = vpop.eup %2668  ;;  %2688 = vrcp.f32 %v1616_v38  ;;  %v1487_v43 = vadd.f32 %v1486_v40, %v3178_v56  ;;  %v1488_v15 = vpop.f32.mrb[58].mxu1  ;;  %v1716_v38 = vld [vmem:[#allocation13 + $0x1a0] sm:$0xff] }
 0x48d   :  { %v2671_v44 = vpop.eup %2670  ;;  %vm1740_vm12 = vcmp.lt.f32.partialorder %v1708_v37, %v2669_v41  ;;  %2690 = vrcp.f32 %v1617_v14  ;;  %v2125_v1 = vmul.f32 -1.442695, %v1485_v18  ;;  %v1489_v2 = vadd.f32 %v1488_v15, %v3176_v55  ;;  %v1490_v46 = vpop.f32.mrb[59].mxu1  ;;  %v1717_v14 = vld [vmem:[#allocation13 + $0x1a8] sm:$0xff]  ;;  %v1718_v41 = vld [vmem:[#allocation13 + $0x1b0] sm:$0xff]  ;;  %v1719_v15 = vld [vmem:[#allocation13 + $0x1b8] sm:$0xff] }
 0x48e   :  { %v2673_v47 = vpop.eup %2672  ;;  %v2145_v48 = vsel %vm1740_vm12, 1.0, %v2936_v16  ;;  %vm1741_vm13 = vcmp.lt.f32.partialorder %v1709_v13, %v2671_v44  ;;  %v2126_v49 = vmul.f32 -1.442695, %v1487_v43  ;;  %v1491_v3 = vadd.f32 %v1490_v46, %v3178_v56 }
 0x48f   :  { %v2675_v51 = vpop.eup %2674  ;;  %1836 = vst [vmem:[#allocation14 + $0x60] sm:$0xff] %v2145_v48  ;;  %v2146_v4 = vsel %vm1741_vm13, 1.0, %v2936_v16  ;;  %vm1742_vm14 = vcmp.lt.f32.partialorder %v1710_v42, %v2673_v47  ;;  %2692 = vpow2.f32 %v2125_v1  ;;  %v2127_v52 = vmul.f32 -1.442695, %v1489_v2 }
 0x490   :  { %v2677_v53 = vpop.eup %2676  ;;  %1837 = vst [vmem:[#allocation14 + $0x68] sm:$0xff] %v2146_v4  ;;  %v2147_v54 = vsel %vm1742_vm14, 1.0, %v2936_v16  ;;  %vm1743_vm15 = vcmp.lt.f32.partialorder %v1711_v45, %v2675_v51  ;;  %2694 = vpow2.f32 %v2126_v49  ;;  %v2128_v50 = vmul.f32 -1.442695, %v1491_v3  ;;  %v1720_v4 = vld [vmem:[#allocation13 + $0x1c0] sm:$0xff] }
 0x491   :  { %v2679_v57 = vpop.eup %2678  ;;  %1838 = vst [vmem:[#allocation14 + $0x70] sm:$0xff] %v2147_v54  ;;  %v2148_v58 = vsel %vm1743_vm15, 1.0, %v2936_v16  ;;  %v1618_v59 = vadd.f32 1.0, %v2677_v53  ;;  %2696 = vpow2.f32 %v2127_v52  ;;  %v1721_v54 = vld [vmem:[#allocation13 + $0x1c8] sm:$0xff] }
 0x492   :  { %v2681_v5 = vpop.eup %2680  ;;  %1839 = vst [vmem:[#allocation14 + $0x78] sm:$0xff] %v2148_v58  ;;  %v1619_v6 = vadd.f32 1.0, %v2679_v57  ;;  %2698 = vpow2.f32 %v2128_v50  ;;  %v1494_v60 = vpop.f32.mrb[60].mxu1  ;;  %v1722_v58 = vld [vmem:[#allocation13 + $0x1d0] sm:$0xff] }
 0x493   :  { %v2683_v61 = vpop.eup %2682  ;;  %2700 = vrcp.f32 %v1618_v59  ;;  %v1620_v63 = vadd.f32 1.0, %v2681_v5  ;;  %v1495_v0 = vadd.f32 %v1494_v60, %v3176_v55  ;;  %v1496_v7 = vpop.f32.mrb[61].mxu1 }
 0x494   :  { %v2685_v17 = vpop.eup %2684  ;;  %2702 = vrcp.f32 %v1619_v6  ;;  %v1621_v19 = vadd.f32 1.0, %v2683_v61  ;;  %v1497_v20 = vadd.f32 %v1496_v7, %v3178_v56  ;;  %v1498_v21 = vpop.f32.mrb[62].mxu1  ;;  %v1723_v6 = vld [vmem:[#allocation13 + $0x1d8] sm:$0xff] }
 0x495   :  { %v2687_v22 = vpop.eup %2686  ;;  %2704 = vrcp.f32 %v1620_v63  ;;  %v1622_v24 = vadd.f32 1.0, %v2685_v17  ;;  %v2129_v25 = vmul.f32 -1.442695, %v1495_v0  ;;  %v1499_v26 = vadd.f32 %v1498_v21, %v3176_v55  ;;  %v1500_v9 = vpop.f32.mrb[63].mxu1  ;;  %v1724_v17 = vld [vmem:[#allocation13 + $0x1e0] sm:$0xff] }
 0x496   :  { %v2689_v10 = vpop.eup %2688  ;;  %vm1744_vm0 = vcmp.lt.f32.partialorder %v1712_v62, %v2687_v22  ;;  %2706 = vrcp.f32 %v1621_v19  ;;  %v2130_v27 = vmul.f32 -1.442695, %v1497_v20  ;;  %v1501_v28 = vadd.f32 %v1500_v9, %v3178_v56  ;;  %v1726_v20 = vld [vmem:[#allocation13 + $0x1f0] sm:$0xff]  ;;  %v1727_v22 = vld [vmem:[#allocation13 + $0x1f8] sm:$0xff] }
 0x497   :  { %v2691_v33 = vpop.eup %2690  ;;  %v2149_v29 = vsel %vm1744_vm0, 1.0, %v2936_v16  ;;  %vm1745_vm1 = vcmp.lt.f32.partialorder %v1713_v8, %v2689_v10  ;;  %2708 = vrcp.f32 %v1622_v24  ;;  %v2131_v30 = vmul.f32 -1.442695, %v1499_v26  ;;  %v1725_v8 = vld [vmem:[#allocation13 + $0x1e8] sm:$0xff] }
 0x498   :  { %1840 = vst [vmem:[#allocation14 + $0x80] sm:$0xff] %v2149_v29  ;;  %v2150_v31 = vsel %vm1745_vm1, 1.0, %v2936_v16  ;;  %vm1746_vm2 = vcmp.lt.f32.partialorder %v1714_v23, %v2691_v33  ;;  %2710 = vpow2.f32 %v2129_v25  ;;  %v2132_v11 = vmul.f32 -1.442695, %v1501_v28 }
 0x499   :  { %v2693_v55 = vpop.eup %2692  ;;  %1841 = vst [vmem:[#allocation14 + $0x88] sm:$0xff] %v2150_v31  ;;  %v2151_v32 = vsel %vm1746_vm2, 1.0, %v2936_v16  ;;  %2712 = vpow2.f32 %v2130_v27 }
 0x49a   :  { %v2695_v12 = vpop.eup %2694  ;;  %1842 = vst [vmem:[#allocation14 + $0x90] sm:$0xff] %v2151_v32  ;;  %v1623_v56 = vadd.f32 1.0, %v2693_v55  ;;  %2714 = vpow2.f32 %v2131_v30 }
 0x49b   :  { %v2697_v34 = vpop.eup %2696  ;;  %v1624_v36 = vadd.f32 1.0, %v2695_v12  ;;  %2716 = vpow2.f32 %v2132_v11 }
 0x49c   :  { %v2699_v37 = vpop.eup %2698  ;;  %2718 = vrcp.f32 %v1623_v56  ;;  %v1625_v39 = vadd.f32 1.0, %v2697_v34 }
 0x49d   :  { %v2701_v13 = vpop.eup %2700  ;;  %2720 = vrcp.f32 %v1624_v36  ;;  %v1626_v18 = vadd.f32 1.0, %v2699_v37 }
 0x49e   :  { %v2703_v40 = vpop.eup %2702  ;;  %vm1747_vm3 = vcmp.lt.f32.partialorder %v1715_v35, %v2701_v13  ;;  %2722 = vrcp.f32 %v1625_v39 }
 0x49f   :  { %v2705_v42 = vpop.eup %2704  ;;  %v2152_v43 = vsel %vm1747_vm3, 1.0, %v2936_v16  ;;  %vm1748_vm4 = vcmp.lt.f32.partialorder %v1716_v38, %v2703_v40  ;;  %2724 = vrcp.f32 %v1626_v18 }
 0x4a0   :  { %v2707_v44 = vpop.eup %2706  ;;  %1843 = vst [vmem:[#allocation14 + $0x98] sm:$0xff] %v2152_v43  ;;  %v2153_v45 = vsel %vm1748_vm4, 1.0, %v2936_v16  ;;  %vm1749_vm5 = vcmp.lt.f32.partialorder %v1717_v14, %v2705_v42 }
 0x4a1   :  { %v2709_v1 = vpop.eup %2708  ;;  %1844 = vst [vmem:[#allocation14 + $0xa0] sm:$0xff] %v2153_v45  ;;  %v2154_v2 = vsel %vm1749_vm5, 1.0, %v2936_v16  ;;  %vm1750_vm6 = vcmp.lt.f32.partialorder %v1718_v41, %v2707_v44 }
 0x4a2   :  { %v2711_v46 = vpop.eup %2710  ;;  %1845 = vst [vmem:[#allocation14 + $0xa8] sm:$0xff] %v2154_v2  ;;  %v2155_v47 = vsel %vm1750_vm6, 1.0, %v2936_v16  ;;  %vm1751_vm7 = vcmp.lt.f32.partialorder %v1719_v15, %v2709_v1 }
 0x4a3   :  { %v2713_v48 = vpop.eup %2712  ;;  %1846 = vst [vmem:[#allocation14 + $0xb0] sm:$0xff] %v2155_v47  ;;  %v2156_v49 = vsel %vm1751_vm7, 1.0, %v2936_v16  ;;  %v1627_v3 = vadd.f32 1.0, %v2711_v46 }
 0x4a4   :  { %v2715_v51 = vpop.eup %2714  ;;  %1847 = vst [vmem:[#allocation14 + $0xb8] sm:$0xff] %v2156_v49  ;;  %v1628_v52 = vadd.f32 1.0, %v2713_v48 }
 0x4a5   :  { %v2717_v53 = vpop.eup %2716  ;;  %2726 = vrcp.f32 %v1627_v3  ;;  %v1629_v50 = vadd.f32 1.0, %v2715_v51 }
 0x4a6   :  { %v2719_v57 = vpop.eup %2718  ;;  %2728 = vrcp.f32 %v1628_v52  ;;  %v1630_v59 = vadd.f32 1.0, %v2717_v53 }
 0x4a7   :  { %v2721_v5 = vpop.eup %2720  ;;  %vm1752_vm8 = vcmp.lt.f32.partialorder %v1720_v4, %v2719_v57  ;;  %2730 = vrcp.f32 %v1629_v50 }
 0x4a8   :  { %v2723_v60 = vpop.eup %2722  ;;  %v2157_v61 = vsel %vm1752_vm8, 1.0, %v2936_v16  ;;  %vm1753_vm9 = vcmp.lt.f32.partialorder %v1721_v54, %v2721_v5  ;;  %2732 = vrcp.f32 %v1630_v59 }
 0x4a9   :  { %v2725_v62 = vpop.eup %2724  ;;  %1848 = vst [vmem:[#allocation14 + $0xc0] sm:$0xff] %v2157_v61  ;;  %v2158_v63 = vsel %vm1753_vm9, 1.0, %v2936_v16  ;;  %vm1754_vm10 = vcmp.lt.f32.partialorder %v1722_v58, %v2723_v60 }
 0x4aa   :  { %1849 = vst [vmem:[#allocation14 + $0xc8] sm:$0xff] %v2158_v63  ;;  %v2159_v0 = vsel %vm1754_vm10, 1.0, %v2936_v16  ;;  %vm1755_vm11 = vcmp.lt.f32.partialorder %v1723_v6, %v2725_v62 }
 0x4ab   :  { %1850 = vst [vmem:[#allocation14 + $0xd0] sm:$0xff] %v2159_v0  ;;  %v2160_v7 = vsel %vm1755_vm11, 1.0, %v2936_v16 }
 0x4ac   :  { %1851 = vst [vmem:[#allocation14 + $0xd8] sm:$0xff] %v2160_v7 }
 0x4af   :  { %v2727_v19 = vpop.eup %2726 }
 0x4b0   :  { %v2729_v21 = vpop.eup %2728  ;;  %vm1756_vm12 = vcmp.lt.f32.partialorder %v1724_v17, %v2727_v19 }
 0x4b1   :  { %v2731_v23 = vpop.eup %2730  ;;  %v2161_v24 = vsel %vm1756_vm12, 1.0, %v2936_v16  ;;  %vm1757_vm13 = vcmp.lt.f32.partialorder %v1725_v8, %v2729_v21 }
 0x4b2   :  { %v2733_v25 = vpop.eup %2732  ;;  %1852 = vst [vmem:[#allocation14 + $0xe0] sm:$0xff] %v2161_v24  ;;  %v2162_v26 = vsel %vm1757_vm13, 1.0, %v2936_v16  ;;  %vm1758_vm14 = vcmp.lt.f32.partialorder %v1726_v20, %v2731_v23 }
 0x4b3   :  { %1853 = vst [vmem:[#allocation14 + $0xe8] sm:$0xff] %v2162_v26  ;;  %v2163_v9 = vsel %vm1758_vm14, 1.0, %v2936_v16  ;;  %vm1759_vm15 = vcmp.lt.f32.partialorder %v1727_v22, %v2733_v25 }
 0x4b4   :  { %1854 = vst [vmem:[#allocation14 + $0xf0] sm:$0xff] %v2163_v9  ;;  %v2164_v10 = vsel %vm1759_vm15, 1.0, %v2936_v16 }
 0x4b5   :  { %1855 = vst [vmem:[#allocation14 + $0xf8] sm:$0xff] %v2164_v10 }
 0x4b6   :  { %2900 = shalt.err (!%p2897_p4)
}
 0x4b7   :  { %s2901_s19 = scalar_lea.hbm %s3371_s7, 4096 }
 0x4b8   :  { %p2902_p5 = scmp.ne.s32.totalorder %s3371_s7, %s2901_s19  ;;  %p2905_p6 = scmp.lt.u32.totalorder %s2901_s19, %s3371_s7 }
 0x4ba   :  { %p2907_p7 = pnand %p2905_p6, %p2902_p5 }
 0x4bc   :  { %2910 = shalt.err (!%p2907_p7)
}
 0x4bd   :  { %1867 = dma.vmem_to_hbm [thread:$0]  %s1862_s17, 4096, %s3371_s7, [#allocation4], %s2929_s5, %s2929_s5, %s2930_s26  }
 0x4be   :  { %2919 = dma.done.wait [#allocation4], 4096  }
 0x4bf   :  { %2920 = vsyncadd [#allocation4], 4294963200 }
 0x4c0   :  { %1871 = vsyncpa [#allocation3], 1 }
 0x4c1   :  { %1872 = vsyncpa [#allocation6], 1 }
 0x4c2   :  { %1873 = vsyncpa [#allocation9], 1 }
 0x4c3   :  { %1874 = vsyncpa [#allocation12], 1 }
 0x4c4   :  { %1875 = vsyncpa [#allocation4], 1 }

</bundles_post_ra>
